<compile_context>
chip_gen: v7x
topology: tpu7x:2x2x1
jax: 0.10.0
libtpu: 0.0.40
codegen_flags: <defaults>
</compile_context>

<pallas_src>
import functools
import math

import jax
import jax.numpy as jnp
import numpy as np
from jax.experimental import pallas as pl
from jax.experimental.pallas import tpu as pltpu

LEAKY_SLOPE = 0.2


# ------------------------- fused Pallas kernel -------------------------

def _pa_fused_kernel(x_ref, gap_ref, w1_ref, b1_ref, w2_ref, b2_ref,
                     w3a_ref, w3b_ref, b3_ref, mp_ref, sh1_ref, av_ref,
                     sh2_ref, u1_ref, u2_ref, o_ref):
    f32 = jnp.float32
    NB = gap_ref.shape[0]            # batch elements folded into this tile
    S2, S4 = av_ref.shape

    def lrelu(v):
        return jnp.where(v >= 0.0, v, LEAKY_SLOPE * v)

    x = x_ref[...]                                                  # (NB*C, S1)

    # GAP == AdaptiveAvgPool3d((1,None,None)): per-batch mean over channels,
    # done as one block-diagonal left matmul (batch stays in rows).
    g = jnp.dot(gap_ref[...], x, preferred_element_type=f32)        # (NB, S1)

    # MaxPool2d(2,2): one lane-stacked tap matmul, then a 4-way max.
    mp = jnp.dot(g, mp_ref[...].astype(f32),
                 preferred_element_type=f32)                        # (NB, 4*S2)
    p1 = jnp.maximum(jnp.maximum(mp[:, 0 * S2:1 * S2], mp[:, 1 * S2:2 * S2]),
                     jnp.maximum(mp[:, 2 * S2:3 * S2], mp[:, 3 * S2:4 * S2]))

    # conv1: 3x3 "same" conv (1 -> 8).  One wide shift matmul produces all 9
    # zero-padded taps lane-stacked; the tap/channel contraction is a pure
    # acc += dot chain with tiny block-diagonal weights.
    sh1 = jnp.dot(p1, sh1_ref[...].astype(f32),
                  preferred_element_type=f32)                       # (NB, 9*S2)
    acc1 = None
    for t in range(9):
        term = jnp.dot(w1_ref[t], sh1[:, t * S2:(t + 1) * S2],
                       preferred_element_type=f32)                  # (NB*8, S2)
        acc1 = term if acc1 is None else acc1 + term
    f_conv1 = lrelu(acc1 + b1_ref[...])                             # (NB*8, S2)

    # AvgPool2d(2,2): one spatial right-matmul shared by all stacked rows.
    p2 = jnp.dot(f_conv1, av_ref[...].astype(f32),
                 preferred_element_type=f32)                        # (NB*8, S4)

    # conv2: 3x3 "same" conv (8 -> 16).  Output rows are ordered
    # (phase r, batch n, shuffle-out-channel co) so PixelShuffle phases are
    # contiguous 4*NB-row blocks.
    sh2 = jnp.dot(p2, sh2_ref[...].astype(f32),
                  preferred_element_type=f32)                       # (NB*8, 9*S4)
    acc2 = None
    for t in range(9):
        term = jnp.dot(w2_ref[t], sh2[:, t * S4:(t + 1) * S4],
                       preferred_element_type=f32)                  # (NB*16, S4)
        acc2 = term if acc2 is None else acc2 + term
    c2 = lrelu(acc2 + b2_ref[...])                                  # (NB*16, S4)

    # PixelShuffle(2) + nearest resize to conv1 spatial, folded into U1.
    blk = 4 * NB
    ps1 = None
    for r in range(4):
        term = jnp.dot(c2[r * blk:(r + 1) * blk], u1_ref[r].astype(f32),
                       preferred_element_type=f32)                  # (NB*4, S2)
        ps1 = term if ps1 is None else ps1 + term

    # concat(f_conv1, ps1) + 1x1 conv (12 -> 4) as a split block-diag matmul.
    # Output rows ordered (phase r, batch n) for the second PixelShuffle.
    c3 = (jnp.dot(w3a_ref[...], f_conv1, preferred_element_type=f32)
          + jnp.dot(w3b_ref[...], ps1, preferred_element_type=f32)
          + b3_ref[...])
    c3 = lrelu(c3)                                                  # (NB*4, S2)

    # PixelShuffle(2) + nearest resize to input spatial, folded into U2.
    res = None
    for r in range(4):
        term = jnp.dot(c3[r * NB:(r + 1) * NB], u2_ref[r].astype(f32),
                       preferred_element_type=f32)                  # (NB, S1)
        res = term if res is None else res + term

    # Sigmoid, lane-dense (NB, S1) store.
    o_ref[...] = 1.0 / (1.0 + jnp.exp(-res))


# ------------------------- constant structure matrices -------------------------

@functools.lru_cache(maxsize=None)
def _structural_matrices(H, W):
    H2, W2 = H // 2, W // 2
    H4, W4 = H2 // 2, W2 // 2
    S1, S2, S4 = H * W, H2 * W2, H4 * W4

    # MaxPool2d(2,2) tap selectors, lane-stacked: (S1, 4*S2).
    MP = np.zeros((S1, 4 * S2), np.float32)
    for dy in range(2):
        for dx in range(2):
            k = dy * 2 + dx
            for i in range(H2):
                for j in range(W2):
                    MP[(2 * i + dy) * W + (2 * j + dx), k * S2 + i * W2 + j] = 1.0

    # Zero-padded 3x3 shift matrices, lane-stacked: (S, 9*S).
    def shifts_cat(h, w):
        s = h * w
        m = np.zeros((s, 9 * s), np.float32)
        for dy in range(3):
            for dx in range(3):
                t = dy * 3 + dx
                for y in range(h):
                    for x in range(w):
                        sy, sx = y + dy - 1, x + dx - 1
                        if 0 <= sy < h and 0 <= sx < w:
                            m[sy * w + sx, t * s + y * w + x] = 1.0
        return m

    SH1 = shifts_cat(H2, W2)          # conv1 spatial
    SH2 = shifts_cat(H4, W4)          # conv2 spatial

    # AvgPool2d(2,2): (S2 -> S4).
    AV = np.zeros((S2, S4), np.float32)
    for dy in range(2):
        for dx in range(2):
            for i in range(H4):
                for j in range(W4):
                    AV[(2 * i + dy) * W2 + (2 * j + dx), i * W4 + j] = 0.25

    # PixelShuffle(2) + nearest resize folded into one selector per phase.
    def shuffle_resize(h_in, w_in, h_out, w_out):
        hs, ws = 2 * h_in, 2 * w_in
        m = np.zeros((4, h_in * w_in, h_out * w_out), np.float32)
        for i in range(h_out):
            si = (i * hs) // h_out          # torch 'nearest' floor semantics
            for j in range(w_out):
                sj = (j * ws) // w_out
                ry, y = si % 2, si // 2
                rx, x = sj % 2, sj // 2
                m[ry * 2 + rx, y * w_in + x, i * w_out + j] = 1.0
        return m

    U1 = shuffle_resize(H4, W4, H2, W2)     # shuffle-1 + resize to conv1 HxW
    U2 = shuffle_resize(H2, W2, H, W)       # shuffle-2 + resize to input HxW
    return MP, SH1, AV, SH2, U1, U2


# ------------------------- weight repack (batch-block-diagonal) -------------------------

def _repack_params(params, NB):
    f32 = jnp.float32
    eye = jnp.eye(NB, dtype=f32)

    # conv1: per-tap kron(I_NB, w1[:, t]) -> (9, NB*8, NB); rows (n, c).
    w1 = params["w1"].astype(f32).reshape(8, 9)                      # (c, t)
    w1k = jnp.einsum("ct,nm->tncm", w1, eye).reshape(9, NB * 8, NB)
    b1k = jnp.tile(params["b1"].astype(f32), (NB,)).reshape(NB * 8, 1)

    # conv2: rows ordered (phase r, batch n, shuffle-out-channel co),
    # columns (batch m, in-channel ci).  perm[r*4+co] = co*4+r.
    perm = np.array([c * 4 + r for r in range(4) for c in range(4)], np.int32)
    w2 = params["w2"].astype(f32).reshape(16, 8, 9)[perm]            # (r*4+co, ci, t)
    w2 = w2.reshape(4, 4, 8, 9)                                      # (r, co, ci, t)
    w2k = jnp.einsum("rcit,nm->trncmi", w2, eye).reshape(9, NB * 16, NB * 8)
    b2p = params["b2"].astype(f32)[perm].reshape(4, 4)               # (r, co)
    b2k = jnp.broadcast_to(b2p[:, None, :], (4, NB, 4)).reshape(NB * 16, 1)

    # 1x1 conv (12 -> 4): rows ordered (phase r, batch n).
    w3 = params["w3"].astype(f32).reshape(4, 12)
    w3a = jnp.einsum("ri,nm->rnmi", w3[:, 0:8], eye).reshape(NB * 4, NB * 8)
    w3b = jnp.einsum("ri,nm->rnmi", w3[:, 8:12], eye).reshape(NB * 4, NB * 4)
    b3k = jnp.repeat(params["b3"].astype(f32), NB).reshape(NB * 4, 1)
    return w1k, b1k, w2k, b2k, w3a, w3b, b3k


# ------------------------- forward wrapper -------------------------

def position_attention_forward(f0, params):
    f0 = f0.astype(jnp.float32)
    N, C, H, W = f0.shape
    if H % 4 != 0 or W % 4 != 0:
        raise ValueError("Position_Attention kernel requires H, W divisible by 4")
    H2, W2 = H // 2, W // 2
    H4, W4 = H2 // 2, W2 // 2
    S1, S2, S4 = H * W, H2 * W2, H4 * W4

    # Batch tiling: fold up to 8 batch elements into the matmul rows per step.
    NB = N if N <= 8 else 8
    n_tiles = (N + NB - 1) // NB
    N_pad = n_tiles * NB
    if N_pad != N:
        f0 = jnp.pad(f0, ((0, N_pad - N), (0, 0), (0, 0), (0, 0)))

    # bf16 structural constants (values 0/1/0.25 are exact in bf16).
    MP, SH1, AV, SH2, U1, U2 = _structural_matrices(H, W)
    bf16 = jnp.bfloat16
    MP, SH1, AV, SH2, U1, U2 = (jnp.asarray(a, bf16)
                                for a in (MP, SH1, AV, SH2, U1, U2))

    # GAP as a block-diagonal mean over channels: (NB, NB*C).
    G = jnp.asarray(np.kron(np.eye(NB, dtype=np.float32),
                            np.ones((1, C), np.float32) / np.float32(C)),
                    jnp.float32)
    w1k, b1k, w2k, b2k, w3a, w3b, b3k = _repack_params(params, NB)

    x_flat = f0.reshape(N_pad * C, S1)

    operands = (x_flat, G, w1k, b1k, w2k, b2k, w3a, w3b, b3k,
                MP, SH1, AV, SH2, U1, U2)
    in_bytes = sum(int(a.size) * a.dtype.itemsize for a in operands)
    vmem_limit = int(min(56 * 1024 * 1024, max(32 * 1024 * 1024, 6 * in_bytes)))

    out = pl.pallas_call(
        _pa_fused_kernel,
        out_shape=jax.ShapeDtypeStruct((N_pad, S1), jnp.float32),
        grid=(n_tiles,),
        in_specs=[
            pl.BlockSpec((NB * C, S1), lambda i: (i, 0)),        # activations
            pl.BlockSpec((NB, NB * C), lambda i: (0, 0)),        # GAP matrix
            pl.BlockSpec((9, NB * 8, NB), lambda i: (0, 0, 0)),  # conv1 taps (kron)
            pl.BlockSpec((NB * 8, 1), lambda i: (0, 0)),         # b1
            pl.BlockSpec((9, NB * 16, NB * 8), lambda i: (0, 0, 0)),  # conv2 taps (kron, perm)
            pl.BlockSpec((NB * 16, 1), lambda i: (0, 0)),        # b2 (perm)
            pl.BlockSpec((NB * 4, NB * 8), lambda i: (0, 0)),    # w3 (f_conv1 part)
            pl.BlockSpec((NB * 4, NB * 4), lambda i: (0, 0)),    # w3 (shuffled part)
            pl.BlockSpec((NB * 4, 1), lambda i: (0, 0)),         # b3
            pl.BlockSpec((S1, 4 * S2), lambda i: (0, 0)),        # maxpool taps (bf16)
            pl.BlockSpec((S2, 9 * S2), lambda i: (0, 0)),        # conv1 shifts (bf16)
            pl.BlockSpec((S2, S4), lambda i: (0, 0)),            # avgpool (bf16)
            pl.BlockSpec((S4, 9 * S4), lambda i: (0, 0)),        # conv2 shifts (bf16)
            pl.BlockSpec((4, S4, S2), lambda i: (0, 0, 0)),      # shuffle1+resize (bf16)
            pl.BlockSpec((4, S2, S1), lambda i: (0, 0, 0)),      # shuffle2+resize (bf16)
        ],
        out_specs=pl.BlockSpec((NB, S1), lambda i: (i, 0)),
        compiler_params=pltpu.CompilerParams(
            dimension_semantics=("parallel",),
            vmem_limit_bytes=vmem_limit),
    )(*operands)

    return out[:N].reshape(N, 1, H, W)


# ------------------------- pure-JAX reference for validation -------------------------

def _pixel_shuffle(x, r):
    N, C, H, W = x.shape
    x = x.reshape(N, C // (r * r), r, r, H, W)
    x = x.transpose(0, 1, 4, 2, 5, 3)
    return x.reshape(N, C // (r * r), H * r, W * r)


def _nearest_resize(x, out_hw):
    N, C, H, W = x.shape
    Ho, Wo = int(out_hw[0]), int(out_hw[1])
    if (H, W) == (Ho, Wo):
        return x
    ys = (jnp.arange(Ho) * H) // Ho
    xs = (jnp.arange(Wo) * W) // Wo
    return x[:, :, ys, :][:, :, :, xs]


def reference_forward(f0, params):
    def conv(x, w, b, pad):
        y = jax.lax.conv_general_dilated(
            x, w, (1, 1), [(pad, pad), (pad, pad)],
            dimension_numbers=("NCHW", "OIHW", "NCHW"))
        return y + b[None, :, None, None]

    def lrelu(x):
        return jnp.where(x >= 0, x, LEAKY_SLOPE * x)

    f = jnp.mean(f0, axis=1, keepdims=True)
    N, C, H, W = f.shape
    f = f.reshape(N, C, H // 2, 2, W // 2, 2).max(axis=(3, 5))
    f_conv1 = lrelu(conv(f, params["w1"], params["b1"], 1))
    N, C, H, W = f_conv1.shape
    f = f_conv1.reshape(N, C, H // 2, 2, W // 2, 2).mean(axis=(3, 5))
    f = lrelu(conv(f, params["w2"], params["b2"], 1))
    f = _pixel_shuffle(f, 2)
    f = _nearest_resize(f, f_conv1.shape[2:])
    f = jnp.concatenate([f_conv1, f], axis=1)
    f = lrelu(conv(f, params["w3"], params["b3"], 0))
    f = _pixel_shuffle(f, 2)
    f = _nearest_resize(f, f0.shape[2:])
    return 1.0 / (1.0 + jnp.exp(-f))


if __name__ == "__main__":
    key = jax.random.PRNGKey(0)
    kx, k1, k2, k3, k4, k5, k6 = jax.random.split(key, 7)

    N, C, H, W = 2, 4, 16, 16
    f0 = jax.random.normal(kx, (N, C, H, W), jnp.float32)

    params = {
        "w1": jax.random.normal(k1, (8, 1, 3, 3), jnp.float32) * (1.0 / math.sqrt(1 * 9)),
        "b1": jax.random.normal(k2, (8,), jnp.float32) * 0.05,
        "w2": jax.random.normal(k3, (16, 8, 3, 3), jnp.float32) * (1.0 / math.sqrt(8 * 9)),
        "b2": jax.random.normal(k4, (16,), jnp.float32) * 0.05,
        "w3": jax.random.normal(k5, (4, 12, 1, 1), jnp.float32) * (1.0 / math.sqrt(12)),
        "b3": jax.random.normal(k6, (4,), jnp.float32) * 0.05,
    }

    out = jax.block_until_ready(position_attention_forward(f0, params))
    ref = jax.block_until_ready(reference_forward(f0, params))

    assert out.shape == (N, 1, H, W), out.shape
    np.testing.assert_allclose(np.asarray(out), np.asarray(ref), atol=1e-5, rtol=1e-5)
    print("KERNEL_OK")
</pallas_src>

<mosaic_0001>
module attributes {stable_mosaic.version = 11 : i64} {
  func.func @_pa_fused_kernel(%arg0: i32, %arg1: memref<8x256xf32, #tpu.memory_space<vmem>>, %arg2: memref<2x8xf32, #tpu.memory_space<vmem>>, %arg3: memref<9x16x2xf32, #tpu.memory_space<vmem>>, %arg4: memref<16x1xf32, #tpu.memory_space<vmem>>, %arg5: memref<9x32x16xf32, #tpu.memory_space<vmem>>, %arg6: memref<32x1xf32, #tpu.memory_space<vmem>>, %arg7: memref<8x16xf32, #tpu.memory_space<vmem>>, %arg8: memref<8x8xf32, #tpu.memory_space<vmem>>, %arg9: memref<8x1xf32, #tpu.memory_space<vmem>>, %arg10: memref<256x256xbf16, #tpu.memory_space<vmem>>, %arg11: memref<64x576xbf16, #tpu.memory_space<vmem>>, %arg12: memref<64x16xbf16, #tpu.memory_space<vmem>>, %arg13: memref<16x144xbf16, #tpu.memory_space<vmem>>, %arg14: memref<4x16x64xbf16, #tpu.memory_space<vmem>>, %arg15: memref<4x64x256xbf16, #tpu.memory_space<vmem>>, %arg16: memref<2x256xf32, #tpu.memory_space<vmem>>) attributes {dimension_semantics = [#tpu.dimension_semantics<parallel>], iteration_bounds = array<i64: 1>, scalar_prefetch = 0 : i64, scratch_operands = 0 : i64, tpu.core_type = #tpu.core_type<tc>, window_params = [{transform_indices = @transform_0, window_bounds = array<i64: 8, 256>}, {pipeline_mode = #tpu.pipeline_mode<synchronous>, transform_indices = @transform_1, window_bounds = array<i64: 2, 8>}, {pipeline_mode = #tpu.pipeline_mode<synchronous>, transform_indices = @transform_2, window_bounds = array<i64: 9, 16, 2>}, {pipeline_mode = #tpu.pipeline_mode<synchronous>, transform_indices = @transform_3, window_bounds = array<i64: 16, 1>}, {pipeline_mode = #tpu.pipeline_mode<synchronous>, transform_indices = @transform_4, window_bounds = array<i64: 9, 32, 16>}, {pipeline_mode = #tpu.pipeline_mode<synchronous>, transform_indices = @transform_5, window_bounds = array<i64: 32, 1>}, {pipeline_mode = #tpu.pipeline_mode<synchronous>, transform_indices = @transform_6, window_bounds = array<i64: 8, 16>}, {pipeline_mode = #tpu.pipeline_mode<synchronous>, transform_indices = @transform_7, window_bounds = array<i64: 8, 8>}, {pipeline_mode = #tpu.pipeline_mode<synchronous>, transform_indices = @transform_8, window_bounds = array<i64: 8, 1>}, {pipeline_mode = #tpu.pipeline_mode<synchronous>, transform_indices = @transform_9, window_bounds = array<i64: 256, 256>}, {pipeline_mode = #tpu.pipeline_mode<synchronous>, transform_indices = @transform_10, window_bounds = array<i64: 64, 576>}, {pipeline_mode = #tpu.pipeline_mode<synchronous>, transform_indices = @transform_11, window_bounds = array<i64: 64, 16>}, {pipeline_mode = #tpu.pipeline_mode<synchronous>, transform_indices = @transform_12, window_bounds = array<i64: 16, 144>}, {pipeline_mode = #tpu.pipeline_mode<synchronous>, transform_indices = @transform_13, window_bounds = array<i64: 4, 16, 64>}, {pipeline_mode = #tpu.pipeline_mode<synchronous>, transform_indices = @transform_14, window_bounds = array<i64: 4, 64, 256>}, {transform_indices = @transform_15, window_bounds = array<i64: 2, 256>}]} {
    %c0 = arith.constant 0 : index
    %c0_0 = arith.constant 0 : index
    %0 = vector.load %arg1[%c0, %c0_0] : memref<8x256xf32, #tpu.memory_space<vmem>>, vector<8x256xf32>
    %c0_1 = arith.constant 0 : index
    %c0_2 = arith.constant 0 : index
    %1 = vector.load %arg2[%c0_1, %c0_2] : memref<2x8xf32, #tpu.memory_space<vmem>>, vector<2x8xf32>
    %cst = arith.constant dense<0.000000e+00> : vector<2x256xf32>
    %2 = tpu.matmul %1, %0, %cst {dimension_numbers = #tpu.dot_dimension_numbers<[1], [0], [0], [1], [0, 0, 1, 1], [], []>} : vector<2x8xf32>, vector<8x256xf32>, vector<2x256xf32> -> vector<2x256xf32>
    %c0_3 = arith.constant 0 : index
    %c0_4 = arith.constant 0 : index
    %3 = vector.load %arg10[%c0_3, %c0_4] : memref<256x256xbf16, #tpu.memory_space<vmem>>, vector<256x256xbf16>
    %4 = arith.extf %3 : vector<256x256xbf16> to vector<256x256xf32>
    %cst_5 = arith.constant dense<0.000000e+00> : vector<2x256xf32>
    %5 = tpu.matmul %2, %4, %cst_5 {dimension_numbers = #tpu.dot_dimension_numbers<[1], [0], [0], [1], [0, 0, 1, 1], [], []>} : vector<2x256xf32>, vector<256x256xf32>, vector<2x256xf32> -> vector<2x256xf32>
    %6 = vector.extract_strided_slice %5 {offsets = [0, 0], sizes = [2, 64], strides = [1, 1]} : vector<2x256xf32> to vector<2x64xf32>
    %7 = vector.extract_strided_slice %5 {offsets = [0, 64], sizes = [2, 64], strides = [1, 1]} : vector<2x256xf32> to vector<2x64xf32>
    %8 = arith.maximumf %6, %7 : vector<2x64xf32>
    %9 = vector.extract_strided_slice %5 {offsets = [0, 128], sizes = [2, 64], strides = [1, 1]} : vector<2x256xf32> to vector<2x64xf32>
    %10 = vector.extract_strided_slice %5 {offsets = [0, 192], sizes = [2, 64], strides = [1, 1]} : vector<2x256xf32> to vector<2x64xf32>
    %11 = arith.maximumf %9, %10 : vector<2x64xf32>
    %12 = arith.maximumf %8, %11 : vector<2x64xf32>
    %c0_6 = arith.constant 0 : index
    %c0_7 = arith.constant 0 : index
    %13 = vector.load %arg11[%c0_6, %c0_7] : memref<64x576xbf16, #tpu.memory_space<vmem>>, vector<64x576xbf16>
    %14 = arith.extf %13 : vector<64x576xbf16> to vector<64x576xf32>
    %cst_8 = arith.constant dense<0.000000e+00> : vector<2x576xf32>
    %15 = tpu.matmul %12, %14, %cst_8 {dimension_numbers = #tpu.dot_dimension_numbers<[1], [0], [0], [1], [0, 0, 1, 1], [], []>} : vector<2x64xf32>, vector<64x576xf32>, vector<2x576xf32> -> vector<2x576xf32>
    %c0_9 = arith.constant 0 : index
    %c0_10 = arith.constant 0 : index
    %c0_11 = arith.constant 0 : index
    %16 = vector.load %arg3[%c0_9, %c0_10, %c0_11] : memref<9x16x2xf32, #tpu.memory_space<vmem>>, vector<1x16x2xf32>
    %17 = vector.shape_cast %16 : vector<1x16x2xf32> to vector<16x2xf32>
    %18 = vector.extract_strided_slice %15 {offsets = [0, 0], sizes = [2, 64], strides = [1, 1]} : vector<2x576xf32> to vector<2x64xf32>
    %cst_12 = arith.constant dense<0.000000e+00> : vector<16x64xf32>
    %19 = tpu.matmul %17, %18, %cst_12 {dimension_numbers = #tpu.dot_dimension_numbers<[1], [0], [0], [1], [0, 0, 1, 1], [], []>} : vector<16x2xf32>, vector<2x64xf32>, vector<16x64xf32> -> vector<16x64xf32>
    %c1 = arith.constant 1 : index
    %c0_13 = arith.constant 0 : index
    %c0_14 = arith.constant 0 : index
    %20 = vector.load %arg3[%c1, %c0_13, %c0_14] : memref<9x16x2xf32, #tpu.memory_space<vmem>>, vector<1x16x2xf32>
    %21 = vector.shape_cast %20 : vector<1x16x2xf32> to vector<16x2xf32>
    %22 = vector.extract_strided_slice %15 {offsets = [0, 64], sizes = [2, 64], strides = [1, 1]} : vector<2x576xf32> to vector<2x64xf32>
    %cst_15 = arith.constant dense<0.000000e+00> : vector<16x64xf32>
    %23 = tpu.matmul %21, %22, %cst_15 {dimension_numbers = #tpu.dot_dimension_numbers<[1], [0], [0], [1], [0, 0, 1, 1], [], []>} : vector<16x2xf32>, vector<2x64xf32>, vector<16x64xf32> -> vector<16x64xf32>
    %24 = arith.addf %19, %23 : vector<16x64xf32>
    %c2 = arith.constant 2 : index
    %c0_16 = arith.constant 0 : index
    %c0_17 = arith.constant 0 : index
    %25 = vector.load %arg3[%c2, %c0_16, %c0_17] : memref<9x16x2xf32, #tpu.memory_space<vmem>>, vector<1x16x2xf32>
    %26 = vector.shape_cast %25 : vector<1x16x2xf32> to vector<16x2xf32>
    %27 = vector.extract_strided_slice %15 {offsets = [0, 128], sizes = [2, 64], strides = [1, 1]} : vector<2x576xf32> to vector<2x64xf32>
    %cst_18 = arith.constant dense<0.000000e+00> : vector<16x64xf32>
    %28 = tpu.matmul %26, %27, %cst_18 {dimension_numbers = #tpu.dot_dimension_numbers<[1], [0], [0], [1], [0, 0, 1, 1], [], []>} : vector<16x2xf32>, vector<2x64xf32>, vector<16x64xf32> -> vector<16x64xf32>
    %29 = arith.addf %24, %28 : vector<16x64xf32>
    %c3 = arith.constant 3 : index
    %c0_19 = arith.constant 0 : index
    %c0_20 = arith.constant 0 : index
    %30 = vector.load %arg3[%c3, %c0_19, %c0_20] : memref<9x16x2xf32, #tpu.memory_space<vmem>>, vector<1x16x2xf32>
    %31 = vector.shape_cast %30 : vector<1x16x2xf32> to vector<16x2xf32>
    %32 = vector.extract_strided_slice %15 {offsets = [0, 192], sizes = [2, 64], strides = [1, 1]} : vector<2x576xf32> to vector<2x64xf32>
    %cst_21 = arith.constant dense<0.000000e+00> : vector<16x64xf32>
    %33 = tpu.matmul %31, %32, %cst_21 {dimension_numbers = #tpu.dot_dimension_numbers<[1], [0], [0], [1], [0, 0, 1, 1], [], []>} : vector<16x2xf32>, vector<2x64xf32>, vector<16x64xf32> -> vector<16x64xf32>
    %34 = arith.addf %29, %33 : vector<16x64xf32>
    %c4 = arith.constant 4 : index
    %c0_22 = arith.constant 0 : index
    %c0_23 = arith.constant 0 : index
    %35 = vector.load %arg3[%c4, %c0_22, %c0_23] : memref<9x16x2xf32, #tpu.memory_space<vmem>>, vector<1x16x2xf32>
    %36 = vector.shape_cast %35 : vector<1x16x2xf32> to vector<16x2xf32>
    %37 = vector.extract_strided_slice %15 {offsets = [0, 256], sizes = [2, 64], strides = [1, 1]} : vector<2x576xf32> to vector<2x64xf32>
    %cst_24 = arith.constant dense<0.000000e+00> : vector<16x64xf32>
    %38 = tpu.matmul %36, %37, %cst_24 {dimension_numbers = #tpu.dot_dimension_numbers<[1], [0], [0], [1], [0, 0, 1, 1], [], []>} : vector<16x2xf32>, vector<2x64xf32>, vector<16x64xf32> -> vector<16x64xf32>
    %39 = arith.addf %34, %38 : vector<16x64xf32>
    %c5 = arith.constant 5 : index
    %c0_25 = arith.constant 0 : index
    %c0_26 = arith.constant 0 : index
    %40 = vector.load %arg3[%c5, %c0_25, %c0_26] : memref<9x16x2xf32, #tpu.memory_space<vmem>>, vector<1x16x2xf32>
    %41 = vector.shape_cast %40 : vector<1x16x2xf32> to vector<16x2xf32>
    %42 = vector.extract_strided_slice %15 {offsets = [0, 320], sizes = [2, 64], strides = [1, 1]} : vector<2x576xf32> to vector<2x64xf32>
    %cst_27 = arith.constant dense<0.000000e+00> : vector<16x64xf32>
    %43 = tpu.matmul %41, %42, %cst_27 {dimension_numbers = #tpu.dot_dimension_numbers<[1], [0], [0], [1], [0, 0, 1, 1], [], []>} : vector<16x2xf32>, vector<2x64xf32>, vector<16x64xf32> -> vector<16x64xf32>
    %44 = arith.addf %39, %43 : vector<16x64xf32>
    %c6 = arith.constant 6 : index
    %c0_28 = arith.constant 0 : index
    %c0_29 = arith.constant 0 : index
    %45 = vector.load %arg3[%c6, %c0_28, %c0_29] : memref<9x16x2xf32, #tpu.memory_space<vmem>>, vector<1x16x2xf32>
    %46 = vector.shape_cast %45 : vector<1x16x2xf32> to vector<16x2xf32>
    %47 = vector.extract_strided_slice %15 {offsets = [0, 384], sizes = [2, 64], strides = [1, 1]} : vector<2x576xf32> to vector<2x64xf32>
    %cst_30 = arith.constant dense<0.000000e+00> : vector<16x64xf32>
    %48 = tpu.matmul %46, %47, %cst_30 {dimension_numbers = #tpu.dot_dimension_numbers<[1], [0], [0], [1], [0, 0, 1, 1], [], []>} : vector<16x2xf32>, vector<2x64xf32>, vector<16x64xf32> -> vector<16x64xf32>
    %49 = arith.addf %44, %48 : vector<16x64xf32>
    %c7 = arith.constant 7 : index
    %c0_31 = arith.constant 0 : index
    %c0_32 = arith.constant 0 : index
    %50 = vector.load %arg3[%c7, %c0_31, %c0_32] : memref<9x16x2xf32, #tpu.memory_space<vmem>>, vector<1x16x2xf32>
    %51 = vector.shape_cast %50 : vector<1x16x2xf32> to vector<16x2xf32>
    %52 = vector.extract_strided_slice %15 {offsets = [0, 448], sizes = [2, 64], strides = [1, 1]} : vector<2x576xf32> to vector<2x64xf32>
    %cst_33 = arith.constant dense<0.000000e+00> : vector<16x64xf32>
    %53 = tpu.matmul %51, %52, %cst_33 {dimension_numbers = #tpu.dot_dimension_numbers<[1], [0], [0], [1], [0, 0, 1, 1], [], []>} : vector<16x2xf32>, vector<2x64xf32>, vector<16x64xf32> -> vector<16x64xf32>
    %54 = arith.addf %49, %53 : vector<16x64xf32>
    %c8 = arith.constant 8 : index
    %c0_34 = arith.constant 0 : index
    %c0_35 = arith.constant 0 : index
    %55 = vector.load %arg3[%c8, %c0_34, %c0_35] : memref<9x16x2xf32, #tpu.memory_space<vmem>>, vector<1x16x2xf32>
    %56 = vector.shape_cast %55 : vector<1x16x2xf32> to vector<16x2xf32>
    %57 = vector.extract_strided_slice %15 {offsets = [0, 512], sizes = [2, 64], strides = [1, 1]} : vector<2x576xf32> to vector<2x64xf32>
    %cst_36 = arith.constant dense<0.000000e+00> : vector<16x64xf32>
    %58 = tpu.matmul %56, %57, %cst_36 {dimension_numbers = #tpu.dot_dimension_numbers<[1], [0], [0], [1], [0, 0, 1, 1], [], []>} : vector<16x2xf32>, vector<2x64xf32>, vector<16x64xf32> -> vector<16x64xf32>
    %59 = arith.addf %54, %58 : vector<16x64xf32>
    %c0_37 = arith.constant 0 : index
    %c0_38 = arith.constant 0 : index
    %60 = vector.load %arg4[%c0_37, %c0_38] : memref<16x1xf32, #tpu.memory_space<vmem>>, vector<16x1xf32>
    %61 = vector.broadcast %60 : vector<16x1xf32> to vector<16x64xf32>
    %62 = arith.addf %59, %61 : vector<16x64xf32>
    %cst_39 = arith.constant 0.000000e+00 : f32
    %63 = vector.broadcast %cst_39 : f32 to vector<16x64xf32>
    %64 = arith.cmpf oge, %62, %63 : vector<16x64xf32>
    %cst_40 = arith.constant 2.000000e-01 : f32
    %65 = vector.broadcast %cst_40 : f32 to vector<16x64xf32>
    %66 = arith.mulf %65, %62 : vector<16x64xf32>
    %67 = arith.select %64, %62, %66 : vector<16x64xi1>, vector<16x64xf32>
    %c0_41 = arith.constant 0 : index
    %c0_42 = arith.constant 0 : index
    %68 = vector.load %arg12[%c0_41, %c0_42] : memref<64x16xbf16, #tpu.memory_space<vmem>>, vector<64x16xbf16>
    %69 = arith.extf %68 : vector<64x16xbf16> to vector<64x16xf32>
    %cst_43 = arith.constant dense<0.000000e+00> : vector<16x16xf32>
    %70 = tpu.matmul %67, %69, %cst_43 {dimension_numbers = #tpu.dot_dimension_numbers<[1], [0], [0], [1], [0, 0, 1, 1], [], []>} : vector<16x64xf32>, vector<64x16xf32>, vector<16x16xf32> -> vector<16x16xf32>
    %c0_44 = arith.constant 0 : index
    %c0_45 = arith.constant 0 : index
    %71 = vector.load %arg13[%c0_44, %c0_45] : memref<16x144xbf16, #tpu.memory_space<vmem>>, vector<16x144xbf16>
    %72 = arith.extf %71 : vector<16x144xbf16> to vector<16x144xf32>
    %cst_46 = arith.constant dense<0.000000e+00> : vector<16x144xf32>
    %73 = tpu.matmul %70, %72, %cst_46 {dimension_numbers = #tpu.dot_dimension_numbers<[1], [0], [0], [1], [0, 0, 1, 1], [], []>} : vector<16x16xf32>, vector<16x144xf32>, vector<16x144xf32> -> vector<16x144xf32>
    %c0_47 = arith.constant 0 : index
    %c0_48 = arith.constant 0 : index
    %c0_49 = arith.constant 0 : index
    %74 = vector.load %arg5[%c0_47, %c0_48, %c0_49] : memref<9x32x16xf32, #tpu.memory_space<vmem>>, vector<1x32x16xf32>
    %75 = vector.shape_cast %74 : vector<1x32x16xf32> to vector<32x16xf32>
    %76 = vector.extract_strided_slice %73 {offsets = [0, 0], sizes = [16, 16], strides = [1, 1]} : vector<16x144xf32> to vector<16x16xf32>
    %cst_50 = arith.constant dense<0.000000e+00> : vector<32x16xf32>
    %77 = tpu.matmul %75, %76, %cst_50 {dimension_numbers = #tpu.dot_dimension_numbers<[1], [0], [0], [1], [0, 0, 1, 1], [], []>} : vector<32x16xf32>, vector<16x16xf32>, vector<32x16xf32> -> vector<32x16xf32>
    %c1_51 = arith.constant 1 : index
    %c0_52 = arith.constant 0 : index
    %c0_53 = arith.constant 0 : index
    %78 = vector.load %arg5[%c1_51, %c0_52, %c0_53] : memref<9x32x16xf32, #tpu.memory_space<vmem>>, vector<1x32x16xf32>
    %79 = vector.shape_cast %78 : vector<1x32x16xf32> to vector<32x16xf32>
    %80 = vector.extract_strided_slice %73 {offsets = [0, 16], sizes = [16, 16], strides = [1, 1]} : vector<16x144xf32> to vector<16x16xf32>
    %cst_54 = arith.constant dense<0.000000e+00> : vector<32x16xf32>
    %81 = tpu.matmul %79, %80, %cst_54 {dimension_numbers = #tpu.dot_dimension_numbers<[1], [0], [0], [1], [0, 0, 1, 1], [], []>} : vector<32x16xf32>, vector<16x16xf32>, vector<32x16xf32> -> vector<32x16xf32>
    %82 = arith.addf %77, %81 : vector<32x16xf32>
    %c2_55 = arith.constant 2 : index
    %c0_56 = arith.constant 0 : index
    %c0_57 = arith.constant 0 : index
    %83 = vector.load %arg5[%c2_55, %c0_56, %c0_57] : memref<9x32x16xf32, #tpu.memory_space<vmem>>, vector<1x32x16xf32>
    %84 = vector.shape_cast %83 : vector<1x32x16xf32> to vector<32x16xf32>
    %85 = vector.extract_strided_slice %73 {offsets = [0, 32], sizes = [16, 16], strides = [1, 1]} : vector<16x144xf32> to vector<16x16xf32>
    %cst_58 = arith.constant dense<0.000000e+00> : vector<32x16xf32>
    %86 = tpu.matmul %84, %85, %cst_58 {dimension_numbers = #tpu.dot_dimension_numbers<[1], [0], [0], [1], [0, 0, 1, 1], [], []>} : vector<32x16xf32>, vector<16x16xf32>, vector<32x16xf32> -> vector<32x16xf32>
    %87 = arith.addf %82, %86 : vector<32x16xf32>
    %c3_59 = arith.constant 3 : index
    %c0_60 = arith.constant 0 : index
    %c0_61 = arith.constant 0 : index
    %88 = vector.load %arg5[%c3_59, %c0_60, %c0_61] : memref<9x32x16xf32, #tpu.memory_space<vmem>>, vector<1x32x16xf32>
    %89 = vector.shape_cast %88 : vector<1x32x16xf32> to vector<32x16xf32>
    %90 = vector.extract_strided_slice %73 {offsets = [0, 48], sizes = [16, 16], strides = [1, 1]} : vector<16x144xf32> to vector<16x16xf32>
    %cst_62 = arith.constant dense<0.000000e+00> : vector<32x16xf32>
    %91 = tpu.matmul %89, %90, %cst_62 {dimension_numbers = #tpu.dot_dimension_numbers<[1], [0], [0], [1], [0, 0, 1, 1], [], []>} : vector<32x16xf32>, vector<16x16xf32>, vector<32x16xf32> -> vector<32x16xf32>
    %92 = arith.addf %87, %91 : vector<32x16xf32>
    %c4_63 = arith.constant 4 : index
    %c0_64 = arith.constant 0 : index
    %c0_65 = arith.constant 0 : index
    %93 = vector.load %arg5[%c4_63, %c0_64, %c0_65] : memref<9x32x16xf32, #tpu.memory_space<vmem>>, vector<1x32x16xf32>
    %94 = vector.shape_cast %93 : vector<1x32x16xf32> to vector<32x16xf32>
    %95 = vector.extract_strided_slice %73 {offsets = [0, 64], sizes = [16, 16], strides = [1, 1]} : vector<16x144xf32> to vector<16x16xf32>
    %cst_66 = arith.constant dense<0.000000e+00> : vector<32x16xf32>
    %96 = tpu.matmul %94, %95, %cst_66 {dimension_numbers = #tpu.dot_dimension_numbers<[1], [0], [0], [1], [0, 0, 1, 1], [], []>} : vector<32x16xf32>, vector<16x16xf32>, vector<32x16xf32> -> vector<32x16xf32>
    %97 = arith.addf %92, %96 : vector<32x16xf32>
    %c5_67 = arith.constant 5 : index
    %c0_68 = arith.constant 0 : index
    %c0_69 = arith.constant 0 : index
    %98 = vector.load %arg5[%c5_67, %c0_68, %c0_69] : memref<9x32x16xf32, #tpu.memory_space<vmem>>, vector<1x32x16xf32>
    %99 = vector.shape_cast %98 : vector<1x32x16xf32> to vector<32x16xf32>
    %100 = vector.extract_strided_slice %73 {offsets = [0, 80], sizes = [16, 16], strides = [1, 1]} : vector<16x144xf32> to vector<16x16xf32>
    %cst_70 = arith.constant dense<0.000000e+00> : vector<32x16xf32>
    %101 = tpu.matmul %99, %100, %cst_70 {dimension_numbers = #tpu.dot_dimension_numbers<[1], [0], [0], [1], [0, 0, 1, 1], [], []>} : vector<32x16xf32>, vector<16x16xf32>, vector<32x16xf32> -> vector<32x16xf32>
    %102 = arith.addf %97, %101 : vector<32x16xf32>
    %c6_71 = arith.constant 6 : index
    %c0_72 = arith.constant 0 : index
    %c0_73 = arith.constant 0 : index
    %103 = vector.load %arg5[%c6_71, %c0_72, %c0_73] : memref<9x32x16xf32, #tpu.memory_space<vmem>>, vector<1x32x16xf32>
    %104 = vector.shape_cast %103 : vector<1x32x16xf32> to vector<32x16xf32>
    %105 = vector.extract_strided_slice %73 {offsets = [0, 96], sizes = [16, 16], strides = [1, 1]} : vector<16x144xf32> to vector<16x16xf32>
    %cst_74 = arith.constant dense<0.000000e+00> : vector<32x16xf32>
    %106 = tpu.matmul %104, %105, %cst_74 {dimension_numbers = #tpu.dot_dimension_numbers<[1], [0], [0], [1], [0, 0, 1, 1], [], []>} : vector<32x16xf32>, vector<16x16xf32>, vector<32x16xf32> -> vector<32x16xf32>
    %107 = arith.addf %102, %106 : vector<32x16xf32>
    %c7_75 = arith.constant 7 : index
    %c0_76 = arith.constant 0 : index
    %c0_77 = arith.constant 0 : index
    %108 = vector.load %arg5[%c7_75, %c0_76, %c0_77] : memref<9x32x16xf32, #tpu.memory_space<vmem>>, vector<1x32x16xf32>
    %109 = vector.shape_cast %108 : vector<1x32x16xf32> to vector<32x16xf32>
    %110 = vector.extract_strided_slice %73 {offsets = [0, 112], sizes = [16, 16], strides = [1, 1]} : vector<16x144xf32> to vector<16x16xf32>
    %cst_78 = arith.constant dense<0.000000e+00> : vector<32x16xf32>
    %111 = tpu.matmul %109, %110, %cst_78 {dimension_numbers = #tpu.dot_dimension_numbers<[1], [0], [0], [1], [0, 0, 1, 1], [], []>} : vector<32x16xf32>, vector<16x16xf32>, vector<32x16xf32> -> vector<32x16xf32>
    %112 = arith.addf %107, %111 : vector<32x16xf32>
    %c8_79 = arith.constant 8 : index
    %c0_80 = arith.constant 0 : index
    %c0_81 = arith.constant 0 : index
    %113 = vector.load %arg5[%c8_79, %c0_80, %c0_81] : memref<9x32x16xf32, #tpu.memory_space<vmem>>, vector<1x32x16xf32>
    %114 = vector.shape_cast %113 : vector<1x32x16xf32> to vector<32x16xf32>
    %115 = vector.extract_strided_slice %73 {offsets = [0, 128], sizes = [16, 16], strides = [1, 1]} : vector<16x144xf32> to vector<16x16xf32>
    %cst_82 = arith.constant dense<0.000000e+00> : vector<32x16xf32>
    %116 = tpu.matmul %114, %115, %cst_82 {dimension_numbers = #tpu.dot_dimension_numbers<[1], [0], [0], [1], [0, 0, 1, 1], [], []>} : vector<32x16xf32>, vector<16x16xf32>, vector<32x16xf32> -> vector<32x16xf32>
    %117 = arith.addf %112, %116 : vector<32x16xf32>
    %c0_83 = arith.constant 0 : index
    %c0_84 = arith.constant 0 : index
    %118 = vector.load %arg6[%c0_83, %c0_84] : memref<32x1xf32, #tpu.memory_space<vmem>>, vector<32x1xf32>
    %119 = vector.broadcast %118 : vector<32x1xf32> to vector<32x16xf32>
    %120 = arith.addf %117, %119 : vector<32x16xf32>
    %cst_85 = arith.constant 0.000000e+00 : f32
    %121 = vector.broadcast %cst_85 : f32 to vector<32x16xf32>
    %122 = arith.cmpf oge, %120, %121 : vector<32x16xf32>
    %cst_86 = arith.constant 2.000000e-01 : f32
    %123 = vector.broadcast %cst_86 : f32 to vector<32x16xf32>
    %124 = arith.mulf %123, %120 : vector<32x16xf32>
    %125 = arith.select %122, %120, %124 : vector<32x16xi1>, vector<32x16xf32>
    %126 = vector.extract_strided_slice %125 {offsets = [0, 0], sizes = [8, 16], strides = [1, 1]} : vector<32x16xf32> to vector<8x16xf32>
    %c0_87 = arith.constant 0 : index
    %c0_88 = arith.constant 0 : index
    %c0_89 = arith.constant 0 : index
    %127 = vector.load %arg14[%c0_87, %c0_88, %c0_89] : memref<4x16x64xbf16, #tpu.memory_space<vmem>>, vector<1x16x64xbf16>
    %128 = vector.shape_cast %127 : vector<1x16x64xbf16> to vector<16x64xbf16>
    %129 = arith.extf %128 : vector<16x64xbf16> to vector<16x64xf32>
    %cst_90 = arith.constant dense<0.000000e+00> : vector<8x64xf32>
    %130 = tpu.matmul %126, %129, %cst_90 {dimension_numbers = #tpu.dot_dimension_numbers<[1], [0], [0], [1], [0, 0, 1, 1], [], []>} : vector<8x16xf32>, vector<16x64xf32>, vector<8x64xf32> -> vector<8x64xf32>
    %131 = vector.extract_strided_slice %125 {offsets = [8, 0], sizes = [8, 16], strides = [1, 1]} : vector<32x16xf32> to vector<8x16xf32>
    %c1_91 = arith.constant 1 : index
    %c0_92 = arith.constant 0 : index
    %c0_93 = arith.constant 0 : index
    %132 = vector.load %arg14[%c1_91, %c0_92, %c0_93] : memref<4x16x64xbf16, #tpu.memory_space<vmem>>, vector<1x16x64xbf16>
    %133 = vector.shape_cast %132 : vector<1x16x64xbf16> to vector<16x64xbf16>
    %134 = arith.extf %133 : vector<16x64xbf16> to vector<16x64xf32>
    %cst_94 = arith.constant dense<0.000000e+00> : vector<8x64xf32>
    %135 = tpu.matmul %131, %134, %cst_94 {dimension_numbers = #tpu.dot_dimension_numbers<[1], [0], [0], [1], [0, 0, 1, 1], [], []>} : vector<8x16xf32>, vector<16x64xf32>, vector<8x64xf32> -> vector<8x64xf32>
    %136 = arith.addf %130, %135 : vector<8x64xf32>
    %137 = vector.extract_strided_slice %125 {offsets = [16, 0], sizes = [8, 16], strides = [1, 1]} : vector<32x16xf32> to vector<8x16xf32>
    %c2_95 = arith.constant 2 : index
    %c0_96 = arith.constant 0 : index
    %c0_97 = arith.constant 0 : index
    %138 = vector.load %arg14[%c2_95, %c0_96, %c0_97] : memref<4x16x64xbf16, #tpu.memory_space<vmem>>, vector<1x16x64xbf16>
    %139 = vector.shape_cast %138 : vector<1x16x64xbf16> to vector<16x64xbf16>
    %140 = arith.extf %139 : vector<16x64xbf16> to vector<16x64xf32>
    %cst_98 = arith.constant dense<0.000000e+00> : vector<8x64xf32>
    %141 = tpu.matmul %137, %140, %cst_98 {dimension_numbers = #tpu.dot_dimension_numbers<[1], [0], [0], [1], [0, 0, 1, 1], [], []>} : vector<8x16xf32>, vector<16x64xf32>, vector<8x64xf32> -> vector<8x64xf32>
    %142 = arith.addf %136, %141 : vector<8x64xf32>
    %143 = vector.extract_strided_slice %125 {offsets = [24, 0], sizes = [8, 16], strides = [1, 1]} : vector<32x16xf32> to vector<8x16xf32>
    %c3_99 = arith.constant 3 : index
    %c0_100 = arith.constant 0 : index
    %c0_101 = arith.constant 0 : index
    %144 = vector.load %arg14[%c3_99, %c0_100, %c0_101] : memref<4x16x64xbf16, #tpu.memory_space<vmem>>, vector<1x16x64xbf16>
    %145 = vector.shape_cast %144 : vector<1x16x64xbf16> to vector<16x64xbf16>
    %146 = arith.extf %145 : vector<16x64xbf16> to vector<16x64xf32>
    %cst_102 = arith.constant dense<0.000000e+00> : vector<8x64xf32>
    %147 = tpu.matmul %143, %146, %cst_102 {dimension_numbers = #tpu.dot_dimension_numbers<[1], [0], [0], [1], [0, 0, 1, 1], [], []>} : vector<8x16xf32>, vector<16x64xf32>, vector<8x64xf32> -> vector<8x64xf32>
    %148 = arith.addf %142, %147 : vector<8x64xf32>
    %c0_103 = arith.constant 0 : index
    %c0_104 = arith.constant 0 : index
    %149 = vector.load %arg7[%c0_103, %c0_104] : memref<8x16xf32, #tpu.memory_space<vmem>>, vector<8x16xf32>
    %cst_105 = arith.constant dense<0.000000e+00> : vector<8x64xf32>
    %150 = tpu.matmul %149, %67, %cst_105 {dimension_numbers = #tpu.dot_dimension_numbers<[1], [0], [0], [1], [0, 0, 1, 1], [], []>} : vector<8x16xf32>, vector<16x64xf32>, vector<8x64xf32> -> vector<8x64xf32>
    %c0_106 = arith.constant 0 : index
    %c0_107 = arith.constant 0 : index
    %151 = vector.load %arg8[%c0_106, %c0_107] : memref<8x8xf32, #tpu.memory_space<vmem>>, vector<8x8xf32>
    %cst_108 = arith.constant dense<0.000000e+00> : vector<8x64xf32>
    %152 = tpu.matmul %151, %148, %cst_108 {dimension_numbers = #tpu.dot_dimension_numbers<[1], [0], [0], [1], [0, 0, 1, 1], [], []>} : vector<8x8xf32>, vector<8x64xf32>, vector<8x64xf32> -> vector<8x64xf32>
    %153 = arith.addf %150, %152 : vector<8x64xf32>
    %c0_109 = arith.constant 0 : index
    %c0_110 = arith.constant 0 : index
    %154 = vector.load %arg9[%c0_109, %c0_110] : memref<8x1xf32, #tpu.memory_space<vmem>>, vector<8x1xf32>
    %155 = vector.broadcast %154 : vector<8x1xf32> to vector<8x64xf32>
    %156 = arith.addf %153, %155 : vector<8x64xf32>
    %cst_111 = arith.constant 0.000000e+00 : f32
    %157 = vector.broadcast %cst_111 : f32 to vector<8x64xf32>
    %158 = arith.cmpf oge, %156, %157 : vector<8x64xf32>
    %cst_112 = arith.constant 2.000000e-01 : f32
    %159 = vector.broadcast %cst_112 : f32 to vector<8x64xf32>
    %160 = arith.mulf %159, %156 : vector<8x64xf32>
    %161 = arith.select %158, %156, %160 : vector<8x64xi1>, vector<8x64xf32>
    %162 = vector.extract_strided_slice %161 {offsets = [0, 0], sizes = [2, 64], strides = [1, 1]} : vector<8x64xf32> to vector<2x64xf32>
    %c0_113 = arith.constant 0 : index
    %c0_114 = arith.constant 0 : index
    %c0_115 = arith.constant 0 : index
    %163 = vector.load %arg15[%c0_113, %c0_114, %c0_115] : memref<4x64x256xbf16, #tpu.memory_space<vmem>>, vector<1x64x256xbf16>
    %164 = vector.shape_cast %163 : vector<1x64x256xbf16> to vector<64x256xbf16>
    %165 = arith.extf %164 : vector<64x256xbf16> to vector<64x256xf32>
    %cst_116 = arith.constant dense<0.000000e+00> : vector<2x256xf32>
    %166 = tpu.matmul %162, %165, %cst_116 {dimension_numbers = #tpu.dot_dimension_numbers<[1], [0], [0], [1], [0, 0, 1, 1], [], []>} : vector<2x64xf32>, vector<64x256xf32>, vector<2x256xf32> -> vector<2x256xf32>
    %167 = vector.extract_strided_slice %161 {offsets = [2, 0], sizes = [2, 64], strides = [1, 1]} : vector<8x64xf32> to vector<2x64xf32>
    %c1_117 = arith.constant 1 : index
    %c0_118 = arith.constant 0 : index
    %c0_119 = arith.constant 0 : index
    %168 = vector.load %arg15[%c1_117, %c0_118, %c0_119] : memref<4x64x256xbf16, #tpu.memory_space<vmem>>, vector<1x64x256xbf16>
    %169 = vector.shape_cast %168 : vector<1x64x256xbf16> to vector<64x256xbf16>
    %170 = arith.extf %169 : vector<64x256xbf16> to vector<64x256xf32>
    %cst_120 = arith.constant dense<0.000000e+00> : vector<2x256xf32>
    %171 = tpu.matmul %167, %170, %cst_120 {dimension_numbers = #tpu.dot_dimension_numbers<[1], [0], [0], [1], [0, 0, 1, 1], [], []>} : vector<2x64xf32>, vector<64x256xf32>, vector<2x256xf32> -> vector<2x256xf32>
    %172 = arith.addf %166, %171 : vector<2x256xf32>
    %173 = vector.extract_strided_slice %161 {offsets = [4, 0], sizes = [2, 64], strides = [1, 1]} : vector<8x64xf32> to vector<2x64xf32>
    %c2_121 = arith.constant 2 : index
    %c0_122 = arith.constant 0 : index
    %c0_123 = arith.constant 0 : index
    %174 = vector.load %arg15[%c2_121, %c0_122, %c0_123] : memref<4x64x256xbf16, #tpu.memory_space<vmem>>, vector<1x64x256xbf16>
    %175 = vector.shape_cast %174 : vector<1x64x256xbf16> to vector<64x256xbf16>
    %176 = arith.extf %175 : vector<64x256xbf16> to vector<64x256xf32>
    %cst_124 = arith.constant dense<0.000000e+00> : vector<2x256xf32>
    %177 = tpu.matmul %173, %176, %cst_124 {dimension_numbers = #tpu.dot_dimension_numbers<[1], [0], [0], [1], [0, 0, 1, 1], [], []>} : vector<2x64xf32>, vector<64x256xf32>, vector<2x256xf32> -> vector<2x256xf32>
    %178 = arith.addf %172, %177 : vector<2x256xf32>
    %179 = vector.extract_strided_slice %161 {offsets = [6, 0], sizes = [2, 64], strides = [1, 1]} : vector<8x64xf32> to vector<2x64xf32>
    %c3_125 = arith.constant 3 : index
    %c0_126 = arith.constant 0 : index
    %c0_127 = arith.constant 0 : index
    %180 = vector.load %arg15[%c3_125, %c0_126, %c0_127] : memref<4x64x256xbf16, #tpu.memory_space<vmem>>, vector<1x64x256xbf16>
    %181 = vector.shape_cast %180 : vector<1x64x256xbf16> to vector<64x256xbf16>
    %182 = arith.extf %181 : vector<64x256xbf16> to vector<64x256xf32>
    %cst_128 = arith.constant dense<0.000000e+00> : vector<2x256xf32>
    %183 = tpu.matmul %179, %182, %cst_128 {dimension_numbers = #tpu.dot_dimension_numbers<[1], [0], [0], [1], [0, 0, 1, 1], [], []>} : vector<2x64xf32>, vector<64x256xf32>, vector<2x256xf32> -> vector<2x256xf32>
    %184 = arith.addf %178, %183 : vector<2x256xf32>
    %cst_129 = arith.constant 0.000000e+00 : f32
    %185 = vector.broadcast %cst_129 : f32 to vector<2x256xf32>
    %186 = arith.subf %185, %184 : vector<2x256xf32>
    %187 = math.exp %186 : vector<2x256xf32>
    %cst_130 = arith.constant 1.000000e+00 : f32
    %188 = vector.broadcast %cst_130 : f32 to vector<2x256xf32>
    %189 = arith.addf %188, %187 : vector<2x256xf32>
    %cst_131 = arith.constant 1.000000e+00 : f32
    %190 = vector.broadcast %cst_131 : f32 to vector<2x256xf32>
    %191 = arith.divf %190, %189 : vector<2x256xf32>
    %c0_132 = arith.constant 0 : index
    %c0_133 = arith.constant 0 : index
    %192 = vector.load %arg16[%c0_132, %c0_133] : memref<2x256xf32, #tpu.memory_space<vmem>>, vector<2x256xf32>
    tpu.vector_store %arg16[%c0_132, %c0_133], %191 {strides = array<i32>} : memref<2x256xf32, #tpu.memory_space<vmem>>, vector<2x256xf32>,
    return
  }
  func.func @transform_0(%arg0: i32) -> (i32, i32) {
    %c0_i32 = arith.constant 0 : i32
    %c0_i32_0 = arith.constant 0 : i32
    return %arg0, %c0_i32 : i32, i32
  }
  func.func @transform_1(%arg0: i32) -> (i32, i32) {
    %c0_i32 = arith.constant 0 : i32
    %c0_i32_0 = arith.constant 0 : i32
    %c0_i32_1 = arith.constant 0 : i32
    return %c0_i32, %c0_i32_0 : i32, i32
  }
  func.func @transform_2(%arg0: i32) -> (i32, i32, i32) {
    %c0_i32 = arith.constant 0 : i32
    %c0_i32_0 = arith.constant 0 : i32
    %c0_i32_1 = arith.constant 0 : i32
    %c0_i32_2 = arith.constant 0 : i32
    return %c0_i32, %c0_i32_0, %c0_i32_1 : i32, i32, i32
  }
  func.func @transform_3(%arg0: i32) -> (i32, i32) {
    %c0_i32 = arith.constant 0 : i32
    %c0_i32_0 = arith.constant 0 : i32
    %c0_i32_1 = arith.constant 0 : i32
    return %c0_i32, %c0_i32_0 : i32, i32
  }
  func.func @transform_4(%arg0: i32) -> (i32, i32, i32) {
    %c0_i32 = arith.constant 0 : i32
    %c0_i32_0 = arith.constant 0 : i32
    %c0_i32_1 = arith.constant 0 : i32
    %c0_i32_2 = arith.constant 0 : i32
    return %c0_i32, %c0_i32_0, %c0_i32_1 : i32, i32, i32
  }
  func.func @transform_5(%arg0: i32) -> (i32, i32) {
    %c0_i32 = arith.constant 0 : i32
    %c0_i32_0 = arith.constant 0 : i32
    %c0_i32_1 = arith.constant 0 : i32
    return %c0_i32, %c0_i32_0 : i32, i32
  }
  func.func @transform_6(%arg0: i32) -> (i32, i32) {
    %c0_i32 = arith.constant 0 : i32
    %c0_i32_0 = arith.constant 0 : i32
    %c0_i32_1 = arith.constant 0 : i32
    return %c0_i32, %c0_i32_0 : i32, i32
  }
  func.func @transform_7(%arg0: i32) -> (i32, i32) {
    %c0_i32 = arith.constant 0 : i32
    %c0_i32_0 = arith.constant 0 : i32
    %c0_i32_1 = arith.constant 0 : i32
    return %c0_i32, %c0_i32_0 : i32, i32
  }
  func.func @transform_8(%arg0: i32) -> (i32, i32) {
    %c0_i32 = arith.constant 0 : i32
    %c0_i32_0 = arith.constant 0 : i32
    %c0_i32_1 = arith.constant 0 : i32
    return %c0_i32, %c0_i32_0 : i32, i32
  }
  func.func @transform_9(%arg0: i32) -> (i32, i32) {
    %c0_i32 = arith.constant 0 : i32
    %c0_i32_0 = arith.constant 0 : i32
    %c0_i32_1 = arith.constant 0 : i32
    return %c0_i32, %c0_i32_0 : i32, i32
  }
  func.func @transform_10(%arg0: i32) -> (i32, i32) {
    %c0_i32 = arith.constant 0 : i32
    %c0_i32_0 = arith.constant 0 : i32
    %c0_i32_1 = arith.constant 0 : i32
    return %c0_i32, %c0_i32_0 : i32, i32
  }
  func.func @transform_11(%arg0: i32) -> (i32, i32) {
    %c0_i32 = arith.constant 0 : i32
    %c0_i32_0 = arith.constant 0 : i32
    %c0_i32_1 = arith.constant 0 : i32
    return %c0_i32, %c0_i32_0 : i32, i32
  }
  func.func @transform_12(%arg0: i32) -> (i32, i32) {
    %c0_i32 = arith.constant 0 : i32
    %c0_i32_0 = arith.constant 0 : i32
    %c0_i32_1 = arith.constant 0 : i32
    return %c0_i32, %c0_i32_0 : i32, i32
  }
  func.func @transform_13(%arg0: i32) -> (i32, i32, i32) {
    %c0_i32 = arith.constant 0 : i32
    %c0_i32_0 = arith.constant 0 : i32
    %c0_i32_1 = arith.constant 0 : i32
    %c0_i32_2 = arith.constant 0 : i32
    return %c0_i32, %c0_i32_0, %c0_i32_1 : i32, i32, i32
  }
  func.func @transform_14(%arg0: i32) -> (i32, i32, i32) {
    %c0_i32 = arith.constant 0 : i32
    %c0_i32_0 = arith.constant 0 : i32
    %c0_i32_1 = arith.constant 0 : i32
    %c0_i32_2 = arith.constant 0 : i32
    return %c0_i32, %c0_i32_0, %c0_i32_1 : i32, i32, i32
  }
  func.func @transform_15(%arg0: i32) -> (i32, i32) {
    %c0_i32 = arith.constant 0 : i32
    %c0_i32_0 = arith.constant 0 : i32
    return %arg0, %c0_i32 : i32, i32
  }
}

</mosaic_0001>

<bundles_post_ra>
// kernel: tpu_custom_call.1
= control target key start
LH: loop header
LB: loop body
LE: loop exit
PB: predicated region body
PF: predicated region fallthrough
CT: control target
= control target key end

     0   :  { %20 = vsyncpa [#allocation3], 0  ;;  %s5528_s0 = inlined_call_operand.hbm [shape: f32[8,256], index: 0, kind: input, shape index: {}]   ;;  %s5529_s1 = inlined_call_operand.vmem [shape: f32[2,8], index: 1, kind: input, shape index: {}]   ;;  %s5530_s2 = inlined_call_operand.vmem [shape: f32[9,16,2], index: 2, kind: input, shape index: {}]   ;;  %s5531_s3 = inlined_call_operand.vmem [shape: f32[16,1], index: 3, kind: input, shape index: {}]   ;;  %s5532_s4 = inlined_call_operand.vmem [shape: f32[9,32,16], index: 4, kind: input, shape index: {}]   ;;  %s5533_s5 = inlined_call_operand.vmem [shape: f32[32,1], index: 5, kind: input, shape index: {}]   ;;  %s5534_s6 = inlined_call_operand.hbm [shape: f32[8,16], index: 6, kind: input, shape index: {}]   ;;  %s5535_s7 = inlined_call_operand.hbm [shape: f32[8,8], index: 7, kind: input, shape index: {}]   ;;  %s5536_s8 = inlined_call_operand.vmem [shape: f32[8,1], index: 8, kind: input, shape index: {}]   ;;  %s5537_s9 = inlined_call_operand.vmem [shape: bf16[256,256], index: 9, kind: input, shape index: {}]   ;;  %s5538_s10 = inlined_call_operand.vmem [shape: bf16[64,576], index: 10, kind: input, shape index: {}]   ;;  %s5539_s11 = inlined_call_operand.vmem [shape: bf16[64,16], index: 11, kind: input, shape index: {}]   ;;  %s5540_s12 = inlined_call_operand.vmem [shape: bf16[16,144], index: 12, kind: input, shape index: {}]   ;;  %s5541_s13 = inlined_call_operand.vmem [shape: bf16[4,16,64], index: 13, kind: input, shape index: {}]   ;;  %s5542_s14 = inlined_call_operand.vmem [shape: bf16[4,64,256], index: 14, kind: input, shape index: {}]   ;;  %s5543_s15 = inlined_call_operand.hbm [shape: f32[2,256], index: 15, kind: output, shape index: {}]  }
   0x1   :  { %21 = vsyncpa [#allocation6], 0 }
   0x2   :  { %22 = vsyncpa [#allocation4], 0  ;;  %s4768_s18 = smov [#allocation5]   ;;  %s4769_s20 = smov [#allocation2]  }
   0x3   :  { %s49_s19 = sshll.u32 %s4768_s18, 4  ;;  %s29_s21 = sshll.u32 %s4769_s20, 4  ;;  %s50_s19 = int_to_ptr.vmem [resolvable:$true] %s49_s19  ;;  %s30_s21 = int_to_ptr.vmem [resolvable:$true] %s29_s21 }
   0x4   :  { %s4674_s24 = scalar_lea.hbm %s5534_s6, 128 }
   0x5   :  { %p4675_p0 = scmp.ne.s32.totalorder %s5534_s6, %s4674_s24  ;;  %p4678_p1 = scmp.lt.u32.totalorder %s4674_s24, %s5534_s6 }
   0x7   :  { %p4680_p2 = pnand %p4678_p1, %p4675_p0 }
   0x9   :  { %4683 = shalt.err (!%p4680_p2)
}
   0xa   :  { %s4684_s29 = scalar_lea.vmem %s50_s19, 128  ;;  %p4689_p4 = scmp.lt.s32.totalorder %s50_s19, %s50_s19 }
   0xb   :  { %p4685_p3 = scmp.ne.s32.totalorder %s50_s19, %s4684_s29  ;;  %p4690_p5 = scmp.lt.s32.totalorder %s4684_s29, %s4684_s29 }
   0xd   :  { %p4691_p6 = por %p4690_p5, %p4689_p4 }
   0xf   :  { %p4692_p7 = pnand %p4691_p6, %p4685_p3 }
  0x11   :  { %4695 = shalt.err (!%p4692_p7)
}
  0x12   :  { %52 = dma.hbm_to_vmem [thread:$0]  %s5534_s6, 128, %s50_s19, [#allocation6]  }
  0x13   :  { %s4696_s20 = scalar_lea.hbm %s5528_s0, 256 }
  0x14   :  { %p4697_p8 = scmp.ne.s32.totalorder %s5528_s0, %s4696_s20  ;;  %p4700_p9 = scmp.lt.u32.totalorder %s4696_s20, %s5528_s0 }
  0x16   :  { %p4702_p10 = pnand %p4700_p9, %p4697_p8 }
  0x18   :  { %4705 = shalt.err (!%p4702_p10)
}
  0x19   :  { %s4706_s26 = scalar_lea.vmem %s30_s21, 256  ;;  %p4711_p12 = scmp.lt.s32.totalorder %s30_s21, %s30_s21 }
  0x1a   :  { %p4707_p11 = scmp.ne.s32.totalorder %s30_s21, %s4706_s26  ;;  %p4712_p13 = scmp.lt.s32.totalorder %s4706_s26, %s4706_s26 }
  0x1c   :  { %p4713_p0 = por %p4712_p13, %p4711_p12 }
  0x1e   :  { %p4714_p1 = pnand %p4713_p0, %p4707_p11 }
  0x20   :  { %4717 = shalt.err (!%p4714_p1)
}
  0x21   :  { %32 = dma.hbm_to_vmem [thread:$0]  %s5528_s0, 256, %s30_s21, [#allocation3]  }
  0x22   :  { %s4770_s27 = smov [#allocation7]   ;;  %s4718_s16 = scalar_lea.hbm %s5535_s7, 128 }
  0x23   :  { %s59_s28 = sshll.u32 %s4770_s27, 4  ;;  %p4719_p2 = scmp.ne.s32.totalorder %s5535_s7, %s4718_s16  ;;  %s60_s28 = int_to_ptr.vmem [resolvable:$true] %s59_s28 }
  0x24   :  { %p4722_p3 = scmp.lt.u32.totalorder %s4718_s16, %s5535_s7 }
  0x26   :  { %p4724_p4 = pnand %p4722_p3, %p4719_p2 }
  0x28   :  { %4727 = shalt.err (!%p4724_p4)
}
  0x29   :  { %s4728_s23 = scalar_lea.vmem %s60_s28, 128  ;;  %p4733_p6 = scmp.lt.s32.totalorder %s60_s28, %s60_s28 }
  0x2a   :  { %p4729_p5 = scmp.ne.s32.totalorder %s60_s28, %s4728_s23  ;;  %p4734_p7 = scmp.lt.s32.totalorder %s4728_s23, %s4728_s23 }
  0x2c   :  { %p4735_p8 = por %p4734_p7, %p4733_p6 }
  0x2e   :  { %p4736_p9 = pnand %p4735_p8, %p4729_p5 }
  0x30   :  { %4739 = shalt.err (!%p4736_p9)
}
  0x31   :  { %62 = dma.hbm_to_vmem [thread:$0]  %s5535_s7, 128, %s60_s28, [#allocation6]  }
  0x32   :  { %4762 = dma.done.wait [#allocation3], 256  }
  0x33   :  { %4763 = vsyncadd [#allocation3], 4294967040 }
  0x34   :  { %4764 = dma.done.wait [#allocation6], 256  }
  0x35   :  { %4765 = vsyncadd [#allocation6], 4294967040  ;;  %v4771_v0 = vmov 0.0   ;;  %v87_v1 = vld [vmem:[#allocation2 + $0x8] sm:$0xff]  ;;  %v86_v2 = vld [vmem:[#allocation2] sm:$0xff]  ;;  %vm89_vm0 = vcmask 64512  }
  0x36   :  { %157 = vmatprep.mubr.f32.mxu0 %v4771_v0  ;;  %v88_v3 = vld [vmem:[%s5529_s1] sm:$0x3]  ;;  %93 = vmatprep.subr.mxu0 %v87_v1  ;;  %v4539_v4 = vld [vmem:[%s5537_s9 + $0x4] ss:$8 sps:$4 sm:$0xff]   ;;  %v4542_v6 = vld [vmem:[%s5537_s9 + $0x14] ss:$8 sps:$4 sm:$0xff]  }
  0x37   :  { %94 = vmatpush1.msra.mxu0 %v86_v2  ;;  %v4541_v5 = vld [vmem:[%s5537_s9] ss:$8 sps:$4 sm:$0xff]   ;;  %4099 = vmatprep.subr.bf16.mxu1 %v4539_v4  ;;  %v4544_v7 = vld [vmem:[%s5537_s9 + $0x10] ss:$8 sps:$4 sm:$0xff]   ;;  %v4545_v8 = vld [vmem:[%s5537_s9 + $0x24] ss:$8 sps:$4 sm:$0xff]  }
  0x38   :  { %3570 = vmatmul.mubr.msk.f32.vlgmr.msra.gmra.mrb[0].mxu0 %vm89_vm0, %v88_v3  ;;  %4101 = vmatpush1.bf16.msra.mxu1 %v4541_v5  ;;  %v4547_v9 = vld [vmem:[%s5537_s9 + $0x20] ss:$8 sps:$4 sm:$0xff]   ;;  %v4548_v10 = vld [vmem:[%s5537_s9 + $0x34] ss:$8 sps:$4 sm:$0xff]   ;;  %v4550_v11 = vld [vmem:[%s5537_s9 + $0x30] ss:$8 sps:$4 sm:$0xff]  }
  0x39   :  { %474 = vmatprep.mubr.f32.mxu0 %v4771_v0  ;;  %4103 = vmatprep.subr.bf16.mxu1 %v4542_v6  ;;  %v4551_v12 = vld [vmem:[%s5537_s9 + $0x44] ss:$8 sps:$4 sm:$0xff]   ;;  %v4553_v13 = vld [vmem:[%s5537_s9 + $0x40] ss:$8 sps:$4 sm:$0xff]   ;;  %v4554_v14 = vld [vmem:[%s5537_s9 + $0x54] ss:$8 sps:$4 sm:$0xff]  }
  0x3a   :  { %v4556_v15 = vld [vmem:[%s5537_s9 + $0x50] ss:$8 sps:$4 sm:$0xff]   ;;  %v4557_v16 = vld [vmem:[%s5537_s9 + $0x64] ss:$8 sps:$4 sm:$0xff]   ;;  %v4559_v17 = vld [vmem:[%s5537_s9 + $0x60] ss:$8 sps:$4 sm:$0xff]  }
  0x3b   :  { %v4560_v18 = vld [vmem:[%s5537_s9 + $0x74] ss:$8 sps:$4 sm:$0xff]   ;;  %v4562_v19 = vld [vmem:[%s5537_s9 + $0x70] ss:$8 sps:$4 sm:$0xff]   ;;  %v4563_v20 = vld [vmem:[%s5537_s9 + $0x84] ss:$8 sps:$4 sm:$0xff]  }
  0x3c   :  { %4105 = vmatpush1.bf16.msra.mxu1 %v4544_v7  ;;  %v4565_v21 = vld [vmem:[%s5537_s9 + $0x80] ss:$8 sps:$4 sm:$0xff]   ;;  %v4566_v22 = vld [vmem:[%s5537_s9 + $0x94] ss:$8 sps:$4 sm:$0xff]   ;;  %v4568_v23 = vld [vmem:[%s5537_s9 + $0x90] ss:$8 sps:$4 sm:$0xff]  }
  0x3d   :  { %4107 = vmatprep.subr.bf16.mxu1 %v4545_v8  ;;  %v4569_v24 = vld [vmem:[%s5537_s9 + $0xa4] ss:$8 sps:$4 sm:$0xff]   ;;  %v4571_v25 = vld [vmem:[%s5537_s9 + $0xa0] ss:$8 sps:$4 sm:$0xff]   ;;  %v4572_v26 = vld [vmem:[%s5537_s9 + $0xb4] ss:$8 sps:$4 sm:$0xff]  }
  0x3e   :  { %v4574_v27 = vld [vmem:[%s5537_s9 + $0xb0] ss:$8 sps:$4 sm:$0xff]   ;;  %v4575_v28 = vld [vmem:[%s5537_s9 + $0xc4] ss:$8 sps:$4 sm:$0xff]   ;;  %v4577_v29 = vld [vmem:[%s5537_s9 + $0xc0] ss:$8 sps:$4 sm:$0xff]  }
  0x3f   :  { %v4578_v30 = vld [vmem:[%s5537_s9 + $0xd4] ss:$8 sps:$4 sm:$0xff]   ;;  %v4580_v31 = vld [vmem:[%s5537_s9 + $0xd0] ss:$8 sps:$4 sm:$0xff]   ;;  %v4581_v32 = vld [vmem:[%s5537_s9 + $0xe4] ss:$8 sps:$4 sm:$0xff]  }
  0x40   :  { %4109 = vmatpush1.bf16.msra.mxu1 %v4547_v9  ;;  %v4583_v33 = vld [vmem:[%s5537_s9 + $0xe0] ss:$8 sps:$4 sm:$0xff]   ;;  %v4584_v34 = vld [vmem:[%s5537_s9 + $0xf4] ss:$8 sps:$4 sm:$0xff]   ;;  %v4586_v35 = vld [vmem:[%s5537_s9 + $0xf0] ss:$8 sps:$4 sm:$0xff]  }
  0x41   :  { %4111 = vmatprep.subr.bf16.mxu1 %v4548_v10  ;;  %v4587_v38 = vld [vmem:[%s5538_s10 + $0x4] ss:$20 sps:$4 sm:$0xff]   ;;  %v4589_v39 = vld [vmem:[%s5538_s10] ss:$20 sps:$4 sm:$0xff]   ;;  %v4592_v41 = vld [vmem:[%s5538_s10 + $0x28] ss:$20 sps:$4 sm:$0xff]  }
  0x42   :  { %v4590_v40 = vld [vmem:[%s5538_s10 + $0x2c] ss:$20 sps:$4 sm:$0xff]   ;;  %4163 = vmatprep.subr.bf16.mxu0 %v4587_v38  ;;  %v4593_v42 = vld [vmem:[%s5538_s10 + $0x54] ss:$20 sps:$4 sm:$0xff]   ;;  %v4595_v43 = vld [vmem:[%s5538_s10 + $0x50] ss:$20 sps:$4 sm:$0xff]  }
  0x43   :  { %4165 = vmatpush1.bf16.msra.mxu0 %v4589_v39  ;;  %v4596_v44 = vld [vmem:[%s5538_s10 + $0x7c] ss:$20 sps:$4 sm:$0xff]   ;;  %v4598_v45 = vld [vmem:[%s5538_s10 + $0x78] ss:$20 sps:$4 sm:$0xff]   ;;  %s4772_s28 = smov 64   ;;  %vm406_vm1 = vcmask 523264  }
  0x44   :  { %4113 = vmatpush1.bf16.msra.mxu1 %v4550_v11  ;;  %4167 = vmatprep.subr.bf16.mxu0 %v4590_v40  ;;  %v4599_v46 = vld [vmem:[%s5538_s10 + $0xc] ss:$20 sps:$4 sm:$0xff]   ;;  %v4601_v53 = vld [vmem:[%s5538_s10 + $0x8] ss:$20 sps:$4 sm:$0xff]   ;;  %v4604_v56 = vld [vmem:[%s5538_s10 + $0x30] ss:$20 sps:$4 sm:$0xff]  }
  0x45   :  { %4115 = vmatprep.subr.bf16.mxu1 %v4551_v12  ;;  %v4602_v55 = vld [vmem:[%s5538_s10 + $0x34] ss:$20 sps:$4 sm:$0xff]   ;;  %v4605_v57 = vld [vmem:[%s5538_s10 + $0x5c] ss:$20 sps:$4 sm:$0xff]   ;;  %v4607_v58 = vld [vmem:[%s5538_s10 + $0x58] ss:$20 sps:$4 sm:$0xff]  }
  0x46   :  { %v4608_v59 = vld [vmem:[%s5538_s10 + $0x84] ss:$20 sps:$4 sm:$0xff]   ;;  %v4610_v60 = vld [vmem:[%s5538_s10 + $0x80] ss:$20 sps:$4 sm:$0xff]   ;;  %v4773_v62 = vmov 0.0|0.0   ;;  %vm4774_vm2 = vmmov 0  }
  0x47   :  { %4169 = vmatpush1.bf16.msra.mxu0 %v4592_v41  ;;  %v4611_v61 = vld [vmem:[%s5538_s10 + $0x10] ss:$20 sps:$4 sm:$0xff]   ;;  %v4612_v63 = vld [vmem:[%s5538_s10 + $0x38] ss:$20 sps:$4 sm:$0xff]   ;;  %v4613_v1 = vld [vmem:[%s5538_s10 + $0x60] ss:$20 sps:$4 sm:$0xff]  }
  0x48   :  { %4117 = vmatpush1.bf16.msra.mxu1 %v4553_v13  ;;  %4171 = vmatprep.subr.bf16.mxu0 %v4593_v42  ;;  %v4614_v2 = vld [vmem:[%s5538_s10 + $0x88] ss:$20 sps:$4 sm:$0xff]   ;;  %v3574_v3 = vld [vmem:[%s5530_s2 + $0x10] sm:$0xff]  ;;  %vm630_vm3 = vcmask 15360   ;;  %v1424_v11 = vld [vmem:[%s5531_s3] sm:$0xff]  ;;  %v4775_v13 = vmov 0  }
  0x49   :  { %4119 = vmatprep.subr.bf16.mxu1 %v4554_v14  ;;  %v1425_v10 = vld [vmem:[%s5531_s3 + $0x8] sm:$0xff]  ;;  %v3731_v12 = vld [vmem:[%s5539_s11] sm:$0xff]   ;;  %4503 = vset.pattern.permute.xlu1 %v4775_v13  ;;  %vm637_vm4 = vcmask 1041408   ;;  %vm1547_vm7 = vcmask 130048   ;;  %s4777_s24 = smov 112   ;;  %s4778_s25 = smov 80  }
  0x4a   :  { %4502 = vset.pattern.permute.xlu0 %v4775_v13  ;;  %v3762_v14 = vld [vmem:[%s5539_s11 + $0x8] sm:$0xff]   ;;  %s4779_s3 = smov 32   ;;  %s4780_s26 = smov 48  }
  0x4b   :  { %4173 = vmatpush1.bf16.msra.mxu0 %v4595_v43  ;;  %v4615_v38 = vld [vmem:[%s5540_s12 + $0x4] ss:$8 sps:$4 sm:$0xff]   ;;  %v4617_v39 = vld [vmem:[%s5540_s12] ss:$8 sps:$4 sm:$0xff]   ;;  %s4776_s12 = smov 96   ;;  %s4781_s19 = smov 16  }
  0x4c   :  { %4121 = vmatpush1.bf16.msra.mxu1 %v4556_v15  ;;  %4175 = vmatprep.subr.bf16.mxu0 %v4596_v44  ;;  %v3763_v15 = vld [vmem:[%s5539_s11 + $0x10] sm:$0xff]  }
  0x4d   :  { %4123 = vmatprep.subr.bf16.mxu1 %v4557_v16 }
  0x4f   :  { %4177 = vmatpush1.bf16.msra.mxu0 %v4598_v45 }
  0x50   :  { %4125 = vmatpush1.bf16.msra.mxu1 %v4559_v17  ;;  %4179 = vmatprep.subr.bf16.mxu0 %v4599_v46  ;;  %v3575_v17 = vld [vmem:[%s5530_s2 + $0x18] sm:$0xff] }
  0x51   :  { %4127 = vmatprep.subr.bf16.mxu1 %v4560_v18  ;;  %v622_v18 = vld [vmem:[%s5530_s2] sm:$0xff] }
  0x54   :  { %4129 = vmatpush1.bf16.msra.mxu1 %v4562_v19  ;;  %v623_v19 = vld [vmem:[%s5530_s2 + $0x8] sm:$0xff] }
  0x55   :  { %4131 = vmatprep.subr.bf16.mxu1 %v4563_v20  ;;  %v3582_v20 = vld [vmem:[%s5530_s2 + $0x20] sm:$0xff] }
  0x58   :  { %4133 = vmatpush1.bf16.msra.mxu1 %v4565_v21 }
  0x59   :  { %4135 = vmatprep.subr.bf16.mxu1 %v4566_v22  ;;  %v3583_v22 = vld [vmem:[%s5530_s2 + $0x28] sm:$0xff] }
  0x5c   :  { %4137 = vmatpush1.bf16.msra.mxu1 %v4568_v23  ;;  %v3587_v23 = vld [vmem:[%s5530_s2 + $0x30] sm:$0xff] }
  0x5d   :  { %4139 = vmatprep.subr.bf16.mxu1 %v4569_v24  ;;  %v3588_v24 = vld [vmem:[%s5530_s2 + $0x38] sm:$0xff] }
  0x60   :  { %4141 = vmatpush1.bf16.msra.mxu1 %v4571_v25  ;;  %v3592_v25 = vld [vmem:[%s5530_s2 + $0x40] sm:$0xff] }
  0x61   :  { %4143 = vmatprep.subr.bf16.mxu1 %v4572_v26 }
  0x64   :  { %4145 = vmatpush1.bf16.msra.mxu1 %v4574_v27  ;;  %v3593_v27 = vld [vmem:[%s5530_s2 + $0x48] sm:$0xff] }
  0x65   :  { %4147 = vmatprep.subr.bf16.mxu1 %v4575_v28  ;;  %v3597_v28 = vld [vmem:[%s5530_s2 + $0x50] sm:$0xff] }
  0x68   :  { %4149 = vmatpush1.bf16.msra.mxu1 %v4577_v29  ;;  %v3598_v29 = vld [vmem:[%s5530_s2 + $0x58] sm:$0xff] }
  0x69   :  { %4151 = vmatprep.subr.bf16.mxu1 %v4578_v30  ;;  %v3602_v30 = vld [vmem:[%s5530_s2 + $0x60] sm:$0xff] }
  0x6c   :  { %4153 = vmatpush1.bf16.msra.mxu1 %v4580_v31 }
  0x6d   :  { %4155 = vmatprep.subr.bf16.mxu1 %v4581_v32  ;;  %v3603_v32 = vld [vmem:[%s5530_s2 + $0x68] sm:$0xff] }
  0x70   :  { %4157 = vmatpush1.bf16.msra.mxu1 %v4583_v33  ;;  %v3607_v33 = vld [vmem:[%s5530_s2 + $0x70] sm:$0xff] }
  0x71   :  { %4159 = vmatprep.subr.bf16.mxu1 %v4584_v34  ;;  %v3608_v34 = vld [vmem:[%s5530_s2 + $0x78] sm:$0xff] }
  0x74   :  { %4161 = vmatpush1.bf16.msra.mxu1 %v4586_v35  ;;  %v3612_v35 = vld [vmem:[%s5530_s2 + $0x80] sm:$0xff] }
  0x75   :  { %4207 = vmatprep.subr.bf16.mxu1 %v3731_v12 }
 0x10b   :  { %v159_v36 = vpop.f32.mrb[0].mxu0 }
 0x10c   :  { %v161_v37 = vpop.f32.mrb[1].mxu0 }
 0x10d   :  { %324 = vmatprep.mubr.f32.mxu1 %v161_v37  ;;  %v3764_v37 = vld [vmem:[%s5539_s11 + $0x18] sm:$0xff]  }
 0x10e   :  { %325 = vmatmul.mubr.f32.vlgmr.msra.gmra.mrb[0].mxu1 %v159_v36  ;;  %v3613_v36 = vld [vmem:[%s5530_s2 + $0x88] sm:$0xff] }
 0x10f   :  { %4209 = vmatpush3.bf16.msra.mxu1 %v3731_v12  ;;  %v3623_v12 = vld [vmem:[%s5532_s4 + $0x30] sm:$0xff] }
 0x110   :  { %4211 = vmatprep.subr.bf16.mxu1 %v3762_v14 }
 0x113   :  { %4213 = vmatpush3.bf16.msra.mxu1 %v3762_v14 }
 0x114   :  { %4215 = vmatprep.subr.bf16.mxu1 %v3763_v15 }
 0x117   :  { %4217 = vmatpush3.bf16.msra.mxu1 %v3763_v15  ;;  %v3624_v15 = vld [vmem:[%s5532_s4 + $0x38] sm:$0xff] }
 0x118   :  { %4219 = vmatprep.subr.bf16.mxu1 %v3764_v37 }
 0x11b   :  { %4221 = vmatpush3.bf16.msra.mxu1 %v3764_v37 }
 0x11c   :  { %4262 = vmatprep.subr.bf16.mxu1 %v4773_v62 }
 0x1e1   :  { %v326_v47 = vpop.f32.mrb[0].mxu1 }
 0x1e2   :  { %332 = vrot.lane.b32.xlu0 %v326_v47, %s4772_s28  ;;  %v328_v48 = vpop.f32.mrb[1].mxu1 }
 0x1e6   :  { %337 = vrot.lane.b32.xlu0 %v328_v48, %s4772_s28 }
 0x254   :  { %v333_v49 = vpop.permute.xlu0 %332 }
 0x255   :  { %v335_v51 = vmax.f32 %v326_v47, %v333_v49 }
 0x258   :  { %v338_v50 = vpop.permute.xlu0 %337 }
 0x259   :  { %v340_v52 = vmax.f32 %v328_v48, %v338_v50 }
 0x25b   :  { %v341_v54 = vmax.f32 %v335_v51, %v340_v52 }
 0x25d   :  { %3571 = vmatmul.mubr.msk.f32.vlgmr.msra.gmra.mrb[2].mxu0 %vm406_vm1, %v341_v54 }
 0x25e   :  { %4181 = vmatpush1.bf16.msra.mxu0 %v4601_v53  ;;  %545 = vmatprep.mubr.f32.mxu0 %v4771_v0 }
 0x25f   :  { %4183 = vmatprep.subr.bf16.mxu0 %v4602_v55 }
 0x262   :  { %4185 = vmatpush1.bf16.msra.mxu0 %v4604_v56 }
 0x263   :  { %4187 = vmatprep.subr.bf16.mxu0 %v4605_v57 }
 0x266   :  { %4189 = vmatpush1.bf16.msra.mxu0 %v4607_v58 }
 0x267   :  { %4191 = vmatprep.subr.bf16.mxu0 %v4608_v59 }
 0x26a   :  { %4193 = vmatpush1.bf16.msra.mxu0 %v4610_v60 }
 0x26b   :  { %4194 = vmatprep.subr.bf16.mxu0 %v4773_v62 }
 0x26d   :  { %3572 = vmatmul.mubr.msk.f32.vlgmr.msra.gmra.mrb[4].mxu0 %vm406_vm1, %v341_v54 }
 0x26e   :  { %4196 = vmatpush3.bf16.msra.mxu0 %v4611_v61  ;;  %3901 = vmatprep.mubr.msk.f32.mxu0 %vm4774_vm2, %v4771_v0  ;;  %v2621_v61 = vld [vmem:[%s5533_s5 + $0x8] sm:$0xff] }
 0x26f   :  { %4197 = vmatprep.subr.bf16.mxu0 %v4773_v62 }
 0x272   :  { %4199 = vmatpush3.bf16.msra.mxu0 %v4612_v63  ;;  %v2622_v63 = vld [vmem:[%s5533_s5 + $0x10] sm:$0xff] }
 0x273   :  { %4200 = vmatprep.subr.bf16.mxu0 %v4773_v62 }
 0x276   :  { %4202 = vmatpush3.bf16.msra.mxu0 %v4613_v1  ;;  %v2620_v1 = vld [vmem:[%s5533_s5] sm:$0xff] }
 0x277   :  { %4203 = vmatprep.subr.bf16.mxu0 %v4773_v62 }
 0x27a   :  { %4205 = vmatpush3.bf16.msra.mxu0 %v4614_v2  ;;  %v3121_v2 = vld [vmem:[%s5536_s8] sm:$0xff] }
 0x27d   :  { %3902 = vmatmul.mubr.msk.f32.vlgmr.msra.gmra.mrb[6].mxu0 %vm406_vm1, %v341_v54  ;;  %v3621_v54 = vld [vmem:[%s5532_s4 + $0x20] sm:$0xff] }
 0x27e   :  { %3906 = vmatprep.mubr.msk.f32.mxu0 %vm630_vm3, %v3574_v3  ;;  %v2623_v3 = vld [vmem:[%s5533_s5 + $0x18] sm:$0xff] }
 0x330   :  { %v476_v4 = vpop.f32.mrb[2].mxu0 }
 0x331   :  { %628 = vrot.lane.b32.xlu1 %v476_v4, %s4772_s28  ;;  %v478_v5 = vpop.f32.mrb[3].mxu0 }
 0x335   :  { %890 = vrot.lane.b32.xlu1 %v478_v5, %s4772_s28 }
 0x340   :  { %v547_v6 = vpop.f32.mrb[4].mxu0 }
 0x341   :  { %1069 = vrot.lane.b32.xlu0 %v547_v6, %s4772_s28  ;;  %v549_v7 = vpop.f32.mrb[5].mxu0 }
 0x342   :  { %1248 = vrot.lane.b32.xlu1 %v549_v7, %s4772_s28 }
 0x345   :  { %1428 = vperm.xlu0 %4502, %v1424_v11   ;;  %v3622_v11 = vld [vmem:[%s5532_s4 + $0x28] sm:$0xff] }
 0x346   :  { %1433 = vperm.xlu1 %4503, %v1425_v10  }
 0x350   :  { %v5081_v8 = vpop.f32.mrb[6].mxu0 }
 0x351   :  { %v3903_v9 = vpop.f32.mrb[7].mxu0 }
 0x3a3   :  { %v629_v16 = vpop.permute.xlu1 %628 }
 0x3a4   :  { %3904 = vmatprep.subr.msk.mxu0 %vm637_vm4, %v629_v16 }
 0x3a5   :  { %3905 = vmatpush3.msk.msra.mxu0 %vm637_vm4, %v629_v16  ;;  %v1631_v16 = vld [vmem:[%s5532_s4] sm:$0xff] }
 0x3a6   :  { %3907 = vmatmul.mubr.msk.f32.vlgmr.msra.gmra.mrb[8].mxu0 %vm630_vm3, %v3575_v17  ;;  %3909 = vmatprep.subr.msk.mxu0 %vm637_vm4, %v476_v4 }
 0x3a7   :  { %3910 = vmatpush3.msk.msra.mxu0 %vm637_vm4, %v476_v4  ;;  %3911 = vmatprep.mubr.msk.f32.mxu0 %vm630_vm3, %v622_v18  ;;  %v891_v21 = vpop.permute.xlu1 %890 }
 0x3a8   :  { %3914 = vmatprep.subr.msk.mxu0 %vm637_vm4, %v478_v5 }
 0x3ae   :  { %3912 = vmatmul.mubr.msk.f32.vlgmr.msra.gmra.mrb[8].mxu0 %vm630_vm3, %v623_v19  ;;  %v1632_v19 = vld [vmem:[%s5532_s4 + $0x8] sm:$0xff] }
 0x3af   :  { %3915 = vmatpush3.msk.msra.mxu0 %vm637_vm4, %v478_v5  ;;  %3916 = vmatprep.mubr.msk.f32.mxu0 %vm630_vm3, %v3582_v20  ;;  %v1633_v20 = vld [vmem:[%s5532_s4 + $0x10] sm:$0xff] }
 0x3b0   :  { %3919 = vmatprep.subr.msk.mxu0 %vm637_vm4, %v891_v21 }
 0x3b3   :  { %v1070_v26 = vpop.permute.xlu0 %1069 }
 0x3b4   :  { %v1249_v31 = vpop.permute.xlu1 %1248 }
 0x3b6   :  { %3917 = vmatmul.mubr.msk.f32.vlgmr.msra.gmra.mrb[8].mxu0 %vm630_vm3, %v3583_v22 }
 0x3b7   :  { %3920 = vmatpush3.msk.msra.mxu0 %vm637_vm4, %v891_v21  ;;  %3921 = vmatprep.mubr.msk.f32.mxu0 %vm630_vm3, %v3587_v23  ;;  %v1634_v23 = vld [vmem:[%s5532_s4 + $0x18] sm:$0xff] }
 0x3b8   :  { %3924 = vmatprep.subr.msk.mxu0 %vm637_vm4, %v547_v6 }
 0x3be   :  { %3922 = vmatmul.mubr.msk.f32.vlgmr.msra.gmra.mrb[8].mxu0 %vm630_vm3, %v3588_v24  ;;  %v3633_v24 = vld [vmem:[%s5532_s4 + $0x40] sm:$0xff] }
 0x3bf   :  { %3925 = vmatpush3.msk.msra.mxu0 %vm637_vm4, %v547_v6  ;;  %3926 = vmatprep.mubr.msk.f32.mxu0 %vm630_vm3, %v3592_v25 }
 0x3c0   :  { %3929 = vmatprep.subr.msk.mxu0 %vm637_vm4, %v1070_v26 }
 0x3c4   :  { %v1429_v41 = vpop.permute.xlu0 %1428 }
 0x3c5   :  { %v1434_v40 = vpop.permute.xlu1 %1433 }
 0x3c6   :  { %3927 = vmatmul.mubr.msk.f32.vlgmr.msra.gmra.mrb[8].mxu0 %vm630_vm3, %v3593_v27  ;;  %v3634_v27 = vld [vmem:[%s5532_s4 + $0x48] sm:$0xff] }
 0x3c7   :  { %3930 = vmatpush3.msk.msra.mxu0 %vm637_vm4, %v1070_v26  ;;  %3931 = vmatprep.mubr.msk.f32.mxu0 %vm630_vm3, %v3597_v28  ;;  %v3635_v28 = vld [vmem:[%s5532_s4 + $0x50] sm:$0xff] }
 0x3c8   :  { %3934 = vmatprep.subr.msk.mxu0 %vm637_vm4, %v549_v7 }
 0x3ce   :  { %3932 = vmatmul.mubr.msk.f32.vlgmr.msra.gmra.mrb[8].mxu0 %vm630_vm3, %v3598_v29 }
 0x3cf   :  { %3935 = vmatpush3.msk.msra.mxu0 %vm637_vm4, %v549_v7  ;;  %3936 = vmatprep.mubr.msk.f32.mxu0 %vm630_vm3, %v3602_v30 }
 0x3d0   :  { %3939 = vmatprep.subr.msk.mxu0 %vm637_vm4, %v1249_v31 }
 0x3d6   :  { %3937 = vmatmul.mubr.msk.f32.vlgmr.msra.gmra.mrb[8].mxu0 %vm630_vm3, %v3603_v32  ;;  %v3641_v32 = vld [vmem:[%s5532_s4 + $0x60] sm:$0xff] }
 0x3d7   :  { %3940 = vmatpush3.msk.msra.mxu0 %vm637_vm4, %v1249_v31  ;;  %3941 = vmatprep.mubr.msk.f32.mxu0 %vm630_vm3, %v3607_v33  ;;  %v3636_v31 = vld [vmem:[%s5532_s4 + $0x58] sm:$0xff] }
 0x3d8   :  { %3944 = vmatprep.subr.msk.mxu0 %vm637_vm4, %v5081_v8 }
 0x3de   :  { %3942 = vmatmul.mubr.msk.f32.vlgmr.msra.gmra.mrb[8].mxu0 %vm630_vm3, %v3608_v34 }
 0x3df   :  { %3945 = vmatpush3.msk.msra.mxu0 %vm637_vm4, %v5081_v8  ;;  %3946 = vmatprep.mubr.msk.f32.mxu0 %vm630_vm3, %v3612_v35  ;;  %v3642_v35 = vld [vmem:[%s5532_s4 + $0x68] sm:$0xff] }
 0x3e0   :  { %4223 = vmatprep.subr.bf16.mxu0 %v4615_v38 }
 0x3e6   :  { %3947 = vmatmul.mubr.msk.f32.vlgmr.msra.gmra.mrb[8].mxu0 %vm630_vm3, %v3613_v36  ;;  %v3643_v36 = vld [vmem:[%s5532_s4 + $0x70] sm:$0xff] }
 0x3e7   :  { %1618 = vmatprep.mubr.f32.mxu0 %v4771_v0  ;;  %4225 = vmatpush1.bf16.msra.mxu0 %v4617_v39  ;;  %v3644_v39 = vld [vmem:[%s5532_s4 + $0x78] sm:$0xff] }
 0x4b9   :  { %v3948_v42 = vpop.f32.mrb[8].mxu0 }
 0x4ba   :  { %v1437_v43 = vadd.f32 %v3948_v42, %v1434_v40  ;;  %v1413_v44 = vpop.f32.mrb[9].mxu0  ;;  %v3649_v40 = vld [vmem:[%s5532_s4 + $0x80] sm:$0xff] }
 0x4bb   :  { %v1436_v45 = vadd.f32 %v1429_v41, %v1413_v44  ;;  %v3651_v44 = vld [vmem:[%s5532_s4 + $0x90] sm:$0xff] }
 0x4bc   :  { %vm1439_vm5 = vcmp.ge.f32.partialorder %v1437_v43, 0.0  ;;  %v1441_v46 = vmul.f32 0.2, %v1437_v43 }
 0x4bd   :  { %vm1438_vm6 = vcmp.ge.f32.partialorder %v1436_v45, 0.0  ;;  %v1440_v47 = vmul.f32 0.2, %v1436_v45 }
 0x4be   :  { %v5197_v48 = vsel %vm1439_vm5, %v1437_v43, %v1441_v46  ;;  %v3650_v43 = vld [vmem:[%s5532_s4 + $0x88] sm:$0xff] }
 0x4bf   :  { %v5199_v49 = vsel %vm1438_vm6, %v1436_v45, %v1440_v47  ;;  %v3652_v47 = vld [vmem:[%s5532_s4 + $0x98] sm:$0xff] }
 0x4c0   :  { %3965 = vmatprep.mubr.msk.f32.mxu1 %vm406_vm1, %v5199_v49  ;;  %v4275_v50 = vpack.c.bf16 %v5197_v48, %v5199_v49  ;;  %v4626_v49 = vld [vmem:[%s5542_s14 + $0x60] ss:$8 sps:$4 sm:$0xff]  }
 0x4c1   :  { %3966 = vmatmul.mubr.msk.f32.vlgmr.msra.gmra.mrb[2].mxu1 %vm406_vm1, %v5197_v48  ;;  %v4624_v48 = vld [vmem:[%s5542_s14 + $0x64] ss:$8 sps:$4 sm:$0xff]  }
 0x4c2   :  { %4062 = vmatprep.mubr.msk.f32.mxu1 %vm4774_vm2, %v4771_v0 }
 0x594   :  { %v3967_v51 = vpop.f32.mrb[2].mxu1 }
 0x595   :  { %v1532_v52 = vpop.f32.mrb[3].mxu1 }
 0x596   :  { %3619 = vmatmul.mubr.msk.f32.vlgmr.msra.gmra.mrb[10].mxu0 %vm1547_vm7, %v1532_v52 }
 0x597   :  { %1624 = vmatprep.mubr.f32.mxu0 %v4771_v0 }
 0x59a   :  { %3620 = vmatmul.mubr.msk.f32.gmra.mrb[12].mxu0 %vm1547_vm7, %v3967_v51  ;;  %v3657_v51 = vld [vmem:[%s5532_s4 + $0xa0] sm:$0xff] }
 0x59b   :  { %3972 = vmatprep.mubr.msk.f32.mxu0 %vm1547_vm7, %v3621_v54  ;;  %v3658_v54 = vld [vmem:[%s5532_s4 + $0xa8] sm:$0xff] }
 0x669   :  { %v1620_v53 = vpop.f32.mrb[10].mxu0 }
 0x66a   :  { %v1622_v55 = vpop.f32.mrb[11].mxu0 }
 0x66d   :  { %v1626_v56 = vpop.f32.mrb[12].mxu0 }
 0x66e   :  { %v1628_v57 = vpop.f32.mrb[13].mxu0  ;;  %v4509_v58 = vpack.i.bf16 %v1626_v56, %v1620_v53  ;;  %v4230_v60 = vpack.c.bf16 %v1626_v56, %v1620_v53 }
 0x66f   :  { %v5216_v59 = vpack.c.bf16 %v1628_v57, %v1622_v55  ;;  %v3659_v55 = vld [vmem:[%s5532_s4 + $0xb0] sm:$0xff]  ;;  %v3660_v57 = vld [vmem:[%s5532_s4 + $0xb8] sm:$0xff] }
 0x670   :  { %4510 = vrot.lane.b32.xlu0 %v4509_v58, %s4776_s12  ;;  %4505 = vrot.lane.b32.xlu1 %v4509_v58, %s4777_s24 }
 0x674   :  { %4520 = vrot.lane.b32.xlu0 %v4509_v58, %s4772_s28  ;;  %4515 = vrot.lane.b32.xlu1 %v4509_v58, %s4778_s25 }
 0x678   :  { %4530 = vrot.lane.b32.xlu0 %v4509_v58, %s4779_s3  ;;  %4525 = vrot.lane.b32.xlu1 %v4509_v58, %s4780_s26 }
 0x67c   :  { %2631 = vperm.xlu0 %4502, %v2621_v61   ;;  %4535 = vrot.lane.b32.xlu1 %v4509_v58, %s4781_s19  ;;  %v3665_v58 = vld [vmem:[%s5532_s4 + $0xc0] sm:$0xff]  ;;  %v3667_v61 = vld [vmem:[%s5532_s4 + $0xd0] sm:$0xff] }
 0x680   :  { %2636 = vperm.xlu0 %4502, %v2622_v63   ;;  %2626 = vperm.xlu1 %4503, %v2620_v1   ;;  %v3668_v63 = vld [vmem:[%s5532_s4 + $0xd8] sm:$0xff]  ;;  %v3673_v1 = vld [vmem:[%s5532_s4 + $0xe0] sm:$0xff] }
 0x684   :  { %3124 = vperm.xlu0 %4502, %v3121_v2   ;;  %2641 = vperm.xlu1 %4503, %v2623_v3   ;;  %v3674_v2 = vld [vmem:[%s5532_s4 + $0xe8] sm:$0xff]  ;;  %v3675_v3 = vld [vmem:[%s5532_s4 + $0xf0] sm:$0xff] }
 0x6e2   :  { %v4506_v4 = vpop.permute.xlu1 %4505  ;;  %v4511_v7 = vpop.permute.xlu0 %4510 }
 0x6e3   :  { %v4508_v5 = vunpack.i.h.bf16 %v4506_v4  ;;  %v4507_v6 = vunpack.i.l.bf16 %v4506_v4  ;;  %v4513_v9 = vunpack.i.h.bf16 %v4511_v7  ;;  %v4512_v10 = vunpack.i.l.bf16 %v4511_v7  ;;  %v3676_v4 = vld [vmem:[%s5532_s4 + $0xf8] sm:$0xff] }
 0x6e4   :  { %v3684_v7 = vld [vmem:[%s5532_s4 + $0x118] sm:$0xff] }
 0x6e5   :  { %v4226_v8 = vpack.c.bf16 %v4508_v5, %v4507_v6  ;;  %v4234_v13 = vpack.c.bf16 %v4513_v9, %v4512_v10  ;;  %v3681_v5 = vld [vmem:[%s5532_s4 + $0x100] sm:$0xff]  ;;  %v3682_v6 = vld [vmem:[%s5532_s4 + $0x108] sm:$0xff] }
 0x6e6   :  { %v4516_v14 = vpop.permute.xlu1 %4515  ;;  %v4521_v22 = vpop.permute.xlu0 %4520 }
 0x6e7   :  { %4227 = vmatprep.subr.bf16.mxu0 %v4226_v8  ;;  %v4518_v17 = vunpack.i.h.bf16 %v4516_v14  ;;  %v4517_v18 = vunpack.i.l.bf16 %v4516_v14  ;;  %v4523_v25 = vunpack.i.h.bf16 %v4521_v22  ;;  %v4522_v26 = vunpack.i.l.bf16 %v4521_v22  ;;  %v3766_v22 = vld [vmem:[%s5541_s13 + $0x10] sm:$0xff]  }
 0x6e8   :  { %4229 = vmatpush3.bf16.msra.mxu0 %v4226_v8  ;;  %v3765_v8 = vld [vmem:[%s5541_s13 + $0x8] sm:$0xff]  }
 0x6e9   :  { %4231 = vmatprep.subr.bf16.mxu0 %v4230_v60  ;;  %v4238_v21 = vpack.c.bf16 %v4518_v17, %v4517_v18  ;;  %v4242_v29 = vpack.c.bf16 %v4523_v25, %v4522_v26  ;;  %4264 = vmatpush3.bf16.msra.mxu1 %v3765_v8  ;;  %v4656_v8 = vld [vmem:[%s5542_s14 + $0xc0] ss:$8 sps:$4 sm:$0xff]  }
 0x6ea   :  { %v4526_v30 = vpop.permute.xlu1 %4525  ;;  %v4531_v38 = vpop.permute.xlu0 %4530  ;;  %4265 = vmatprep.subr.bf16.mxu1 %v4773_v62 }
 0x6eb   :  { %3973 = vmatmul.mubr.msk.f32.vlgmr.msra.gmra.mrb[14].mxu0 %vm1547_vm7, %v3622_v11  ;;  %v4528_v33 = vunpack.i.h.bf16 %v4526_v30  ;;  %v4527_v34 = vunpack.i.l.bf16 %v4526_v30  ;;  %v4533_v41 = vunpack.i.h.bf16 %v4531_v38  ;;  %v4532_v42 = vunpack.i.l.bf16 %v4531_v38  ;;  %v4621_v38 = vld [vmem:[%s5542_s14 + $0x54] ss:$8 sps:$4 sm:$0xff]  }
 0x6ec   :  { %4233 = vmatpush3.bf16.msra.mxu0 %v4230_v60  ;;  %3975 = vmatprep.mubr.msk.f32.mxu0 %vm1547_vm7, %v3623_v12  ;;  %v3666_v60 = vld [vmem:[%s5532_s4 + $0xc8] sm:$0xff] }
 0x6ed   :  { %4235 = vmatprep.subr.bf16.mxu0 %v4234_v13  ;;  %v4246_v37 = vpack.c.bf16 %v4528_v33, %v4527_v34  ;;  %v4250_v45 = vpack.c.bf16 %v4533_v41, %v4532_v42  ;;  %v4618_v34 = vld [vmem:[%s5542_s14 + $0x44] ss:$8 sps:$4 sm:$0xff]  }
 0x6ee   :  { %v4536_v46 = vpop.permute.xlu1 %4535 }
 0x6ef   :  { %3976 = vmatmul.mubr.msk.f32.gmra.mrb[16].mxu0 %vm1547_vm7, %v3624_v15  ;;  %v4538_v52 = vunpack.i.h.bf16 %v4536_v46  ;;  %v4537_v53 = vunpack.i.l.bf16 %v4536_v46 }
 0x6f0   :  { %3982 = vmatprep.mubr.msk.f32.mxu0 %vm1547_vm7, %v1631_v16  ;;  %v3747_v16 = vld [vmem:[%s5541_s13] sm:$0xff]  }
 0x6f1   :  { %v4254_v56 = vpack.c.bf16 %v4538_v52, %v4537_v53  ;;  %v4632_v53 = vld [vmem:[%s5542_s14] ss:$8 sps:$4 sm:$0xff]  }
 0x6f3   :  { %3983 = vmatmul.mubr.msk.f32.vlgmr.msra.gmra.mrb[14].mxu0 %vm1547_vm7, %v1632_v19 }
 0x6f4   :  { %4237 = vmatpush3.bf16.msra.mxu0 %v4234_v13  ;;  %3985 = vmatprep.mubr.msk.f32.mxu0 %vm1547_vm7, %v1633_v20 }
 0x6f5   :  { %4239 = vmatprep.subr.bf16.mxu0 %v4238_v21 }
 0x6f7   :  { %3986 = vmatmul.mubr.msk.f32.gmra.mrb[16].mxu0 %vm1547_vm7, %v1634_v23 }
 0x6f8   :  { %3992 = vmatprep.mubr.msk.f32.mxu0 %vm1547_vm7, %v3633_v24 }
 0x6fb   :  { %3993 = vmatmul.mubr.msk.f32.vlgmr.msra.gmra.mrb[14].mxu0 %vm1547_vm7, %v3634_v27  ;;  %v2632_v9 = vpop.permute.xlu0 %2631  ;;  %v3767_v27 = vld [vmem:[%s5541_s13 + $0x18] sm:$0xff]  }
 0x6fc   :  { %4241 = vmatpush3.bf16.msra.mxu0 %v4238_v21  ;;  %3995 = vmatprep.mubr.msk.f32.mxu0 %vm1547_vm7, %v3635_v28 }
 0x6fd   :  { %4243 = vmatprep.subr.bf16.mxu0 %v4242_v29 }
 0x6ff   :  { %3996 = vmatmul.mubr.msk.f32.gmra.mrb[16].mxu0 %vm1547_vm7, %v3636_v31  ;;  %v2627_v14 = vpop.permute.xlu1 %2626  ;;  %v2637_v21 = vpop.permute.xlu0 %2636 }
 0x700   :  { %4002 = vmatprep.mubr.msk.f32.mxu0 %vm1547_vm7, %v3641_v32  ;;  %v2974_v32 = vld [vmem:[#allocation7] sm:$0xff] }
 0x703   :  { %4003 = vmatmul.mubr.msk.f32.vlgmr.msra.gmra.mrb[14].mxu0 %vm1547_vm7, %v3642_v35  ;;  %v2642_v26 = vpop.permute.xlu1 %2641  ;;  %v3125_v46 = vpop.permute.xlu0 %3124 }
 0x704   :  { %4245 = vmatpush3.bf16.msra.mxu0 %v4242_v29  ;;  %4005 = vmatprep.mubr.msk.f32.mxu0 %vm1547_vm7, %v3643_v36  ;;  %v2973_v36 = vld [vmem:[#allocation5] sm:$0xff] }
 0x705   :  { %4247 = vmatprep.subr.bf16.mxu0 %v4246_v37 }
 0x707   :  { %4006 = vmatmul.mubr.msk.f32.gmra.mrb[16].mxu0 %vm1547_vm7, %v3644_v39  ;;  %v4629_v39 = vld [vmem:[%s5542_s14 + $0x70] ss:$8 sps:$4 sm:$0xff]  }
 0x708   :  { %4012 = vmatprep.mubr.msk.f32.mxu0 %vm1547_vm7, %v3649_v40  ;;  %v4630_v40 = vld [vmem:[%s5542_s14 + $0x4] ss:$8 sps:$4 sm:$0xff]  }
 0x70b   :  { %4013 = vmatmul.mubr.msk.f32.vlgmr.msra.gmra.mrb[14].mxu0 %vm1547_vm7, %v3650_v43 }
 0x70c   :  { %4249 = vmatpush3.bf16.msra.mxu0 %v4246_v37  ;;  %4015 = vmatprep.mubr.msk.f32.mxu0 %vm1547_vm7, %v3651_v44  ;;  %v4620_v37 = vld [vmem:[%s5542_s14 + $0x40] ss:$8 sps:$4 sm:$0xff]  }
 0x70d   :  { %4251 = vmatprep.subr.bf16.mxu0 %v4250_v45 }
 0x70f   :  { %4016 = vmatmul.mubr.msk.f32.gmra.mrb[16].mxu0 %vm1547_vm7, %v3652_v47 }
 0x710   :  { %4022 = vmatprep.mubr.msk.f32.mxu0 %vm1547_vm7, %v3657_v51 }
 0x713   :  { %4023 = vmatmul.mubr.msk.f32.vlgmr.msra.gmra.mrb[14].mxu0 %vm1547_vm7, %v3658_v54 }
 0x714   :  { %4253 = vmatpush3.bf16.msra.mxu0 %v4250_v45  ;;  %4025 = vmatprep.mubr.msk.f32.mxu0 %vm1547_vm7, %v3659_v55  ;;  %v4633_v55 = vld [vmem:[%s5542_s14 + $0x14] ss:$8 sps:$4 sm:$0xff]  }
 0x715   :  { %4255 = vmatprep.subr.bf16.mxu0 %v4254_v56 }
 0x717   :  { %4026 = vmatmul.mubr.msk.f32.gmra.mrb[16].mxu0 %vm1547_vm7, %v3660_v57  ;;  %v4636_v57 = vld [vmem:[%s5542_s14 + $0x24] ss:$8 sps:$4 sm:$0xff]  }
 0x718   :  { %4032 = vmatprep.mubr.msk.f32.mxu0 %vm1547_vm7, %v3665_v58  ;;  %v4638_v58 = vld [vmem:[%s5542_s14 + $0x20] ss:$8 sps:$4 sm:$0xff]  }
 0x71b   :  { %4033 = vmatmul.mubr.msk.f32.vlgmr.msra.gmra.mrb[14].mxu0 %vm1547_vm7, %v3666_v60  ;;  %v4639_v60 = vld [vmem:[%s5542_s14 + $0x34] ss:$8 sps:$4 sm:$0xff]  }
 0x71c   :  { %4257 = vmatpush3.bf16.msra.mxu0 %v4254_v56  ;;  %4035 = vmatprep.mubr.msk.f32.mxu0 %vm1547_vm7, %v3667_v61  ;;  %v4635_v56 = vld [vmem:[%s5542_s14 + $0x10] ss:$8 sps:$4 sm:$0xff]  }
 0x71d   :  { %4259 = vmatprep.subr.bf16.mxu0 %v5216_v59  ;;  %v4641_v61 = vld [vmem:[%s5542_s14 + $0x30] ss:$8 sps:$4 sm:$0xff]  }
 0x71f   :  { %4036 = vmatmul.mubr.msk.f32.gmra.mrb[16].mxu0 %vm1547_vm7, %v3668_v63  ;;  %v4642_v63 = vld [vmem:[%s5542_s14 + $0x84] ss:$8 sps:$4 sm:$0xff]  }
 0x720   :  { %4042 = vmatprep.mubr.msk.f32.mxu0 %vm1547_vm7, %v3673_v1  ;;  %v4644_v1 = vld [vmem:[%s5542_s14 + $0x80] ss:$8 sps:$4 sm:$0xff]  }
 0x723   :  { %4043 = vmatmul.mubr.msk.f32.vlgmr.msra.gmra.mrb[14].mxu0 %vm1547_vm7, %v3674_v2  ;;  %v4645_v2 = vld [vmem:[%s5542_s14 + $0x94] ss:$8 sps:$4 sm:$0xff]  }
 0x724   :  { %4261 = vmatpush3.bf16.msra.mxu0 %v5216_v59  ;;  %4045 = vmatprep.mubr.msk.f32.mxu0 %vm1547_vm7, %v3675_v3  ;;  %v3683_v59 = vld [vmem:[%s5532_s4 + $0x110] sm:$0xff] }
 0x725   :  { %v4647_v3 = vld [vmem:[%s5542_s14 + $0x90] ss:$8 sps:$4 sm:$0xff]  }
 0x727   :  { %4046 = vmatmul.mubr.msk.f32.gmra.mrb[16].mxu0 %vm1547_vm7, %v3676_v4  ;;  %v4648_v4 = vld [vmem:[%s5542_s14 + $0xa4] ss:$8 sps:$4 sm:$0xff]  }
 0x728   :  { %4052 = vmatprep.mubr.msk.f32.mxu0 %vm1547_vm7, %v3681_v5  ;;  %v4650_v5 = vld [vmem:[%s5542_s14 + $0xa0] ss:$8 sps:$4 sm:$0xff]  }
 0x72b   :  { %4053 = vmatmul.mubr.msk.f32.vlgmr.msra.gmra.mrb[14].mxu0 %vm1547_vm7, %v3682_v6  ;;  %v4651_v6 = vld [vmem:[%s5542_s14 + $0xb4] ss:$8 sps:$4 sm:$0xff]  }
 0x72c   :  { %4055 = vmatprep.mubr.msk.f32.mxu0 %vm1547_vm7, %v3683_v59  ;;  %v4653_v59 = vld [vmem:[%s5542_s14 + $0xb0] ss:$8 sps:$4 sm:$0xff]  }
 0x72f   :  { %4056 = vmatmul.mubr.msk.f32.gmra.mrb[16].mxu0 %vm1547_vm7, %v3684_v7  ;;  %v4654_v7 = vld [vmem:[%s5542_s14 + $0xc4] ss:$8 sps:$4 sm:$0xff]  }
 0x7fe   :  { %v4054_v10 = vpop.f32.mrb[14].mxu0 }
 0x7ff   :  { %v2645_v11 = vadd.f32 %v4054_v10, %v2632_v9  ;;  %v2597_v12 = vpop.f32.mrb[15].mxu0  ;;  %v4657_v10 = vld [vmem:[%s5542_s14 + $0xd4] ss:$8 sps:$4 sm:$0xff]  }
 0x800   :  { %v2644_v18 = vadd.f32 %v2627_v14, %v2597_v12  ;;  %v4660_v12 = vld [vmem:[%s5542_s14 + $0xe4] ss:$8 sps:$4 sm:$0xff]   ;;  %v4663_v14 = vld [vmem:[%s5542_s14 + $0xf4] ss:$8 sps:$4 sm:$0xff]  }
 0x801   :  { %vm2649_vm8 = vcmp.ge.f32.partialorder %v2645_v11, 0.0  ;;  %v2653_v13 = vmul.f32 0.2, %v2645_v11 }
 0x802   :  { %v4057_v15 = vpop.f32.mrb[16].mxu0  ;;  %v2652_v20 = vmul.f32 0.2, %v2644_v18  ;;  %vm2648_vm9 = vcmp.ge.f32.partialorder %v2644_v18, 0.0 }
 0x803   :  { %v2657_v17 = vsel %vm2649_vm8, %v2645_v11, %v2653_v13  ;;  %v2607_v19 = vpop.f32.mrb[17].mxu0  ;;  %v2647_v28 = vadd.f32 %v4057_v15, %v2642_v26  ;;  %v4659_v11 = vld [vmem:[%s5542_s14 + $0xd0] ss:$8 sps:$4 sm:$0xff]   ;;  %v4662_v13 = vld [vmem:[%s5542_s14 + $0xe0] ss:$8 sps:$4 sm:$0xff]  }
 0x804   :  { %4063 = vmatmul.mubr.msk.f32.vlgmr.msra.gmra.mrb[4].mxu1 %vm1547_vm7, %v2657_v17  ;;  %v2656_v23 = vsel %vm2648_vm9, %v2644_v18, %v2652_v20  ;;  %v2646_v24 = vadd.f32 %v2637_v21, %v2607_v19 }
 0x805   :  { %4267 = vmatpush3.bf16.msra.mxu1 %v3747_v16  ;;  %4069 = vmatprep.mubr.msk.f32.mxu1 %vm4774_vm2, %v4771_v0  ;;  %v2655_v30 = vmul.f32 0.2, %v2647_v28  ;;  %vm2651_vm11 = vcmp.ge.f32.partialorder %v2647_v28, 0.0 }
 0x806   :  { %4268 = vmatprep.subr.bf16.mxu1 %v4773_v62  ;;  %v2654_v25 = vmul.f32 0.2, %v2646_v24  ;;  %vm2650_vm10 = vcmp.ge.f32.partialorder %v2646_v24, 0.0 }
 0x807   :  { %v2659_v31 = vsel %vm2651_vm11, %v2647_v28, %v2655_v30 }
 0x808   :  { %v2658_v29 = vsel %vm2650_vm10, %v2646_v24, %v2654_v25 }
 0x80c   :  { %4070 = vmatmul.mubr.msk.f32.vlgmr.msra.gmra.mrb[4].mxu1 %vm1547_vm7, %v2656_v23 }
 0x80d   :  { %4270 = vmatpush3.bf16.msra.mxu1 %v3766_v22  ;;  %4076 = vmatprep.mubr.msk.f32.mxu1 %vm4774_vm2, %v4771_v0 }
 0x80e   :  { %4271 = vmatprep.subr.bf16.mxu1 %v4773_v62 }
 0x814   :  { %4077 = vmatmul.mubr.msk.f32.vlgmr.msra.gmra.mrb[4].mxu1 %vm1547_vm7, %v2658_v29 }
 0x815   :  { %4273 = vmatpush3.bf16.msra.mxu1 %v3767_v27  ;;  %4083 = vmatprep.mubr.msk.f32.mxu1 %vm4774_vm2, %v4771_v0 }
 0x816   :  { %4086 = vmatprep.subr.mxu1 %v4771_v0 }
 0x81c   :  { %4084 = vmatmul.mubr.msk.f32.vlgmr.msra.gmra.mrb[4].mxu1 %vm1547_vm7, %v2659_v31 }
 0x81d   :  { %4088 = vmatprep.mubr.msk.f32.mxu1 %vm4774_vm2, %v4771_v0 }
 0x8ef   :  { %v2968_v33 = vpop.f32.mrb[4].mxu1 }
 0x8f0   :  { %v4085_v35 = vpop.f32.mrb[5].mxu1  ;;  %4087 = vmatpush3.msra.mxu1 %v2968_v33 }
 0x8f1   :  { %4089 = vmatmul.mubr.msk.f32.vlgmr.msra.gmra.mrb[6].mxu1 %vm89_vm0, %v2974_v32  ;;  %4274 = vmatprep.subr.bf16.mxu1 %v4773_v62  ;;  %v4623_v62 = vld [vmem:[%s5542_s14 + $0x50] ss:$8 sps:$4 sm:$0xff]  }
 0x8f2   :  { %4276 = vmatpush3.bf16.msra.mxu1 %v4275_v50  ;;  %4095 = vmatprep.mubr.msk.f32.mxu1 %vm4774_vm2, %v4771_v0  ;;  %v4627_v50 = vld [vmem:[%s5542_s14 + $0x74] ss:$8 sps:$4 sm:$0xff]  }
 0x8f3   :  { %4278 = vmatprep.subr.bf16.mxu1 %v4618_v34 }
 0x8f5   :  { %4096 = vmatmul.mubr.msk.f32.vlgmr.msra.gmra.mrb[8].mxu1 %vm1547_vm7, %v2973_v36 }
 0x8f6   :  { %4280 = vmatpush1.bf16.msra.mxu1 %v4620_v37  ;;  %3248 = vmatprep.mubr.f32.mxu1 %v4771_v0 }
 0x8f7   :  { %4282 = vmatprep.subr.bf16.mxu1 %v4621_v38 }
 0x8fa   :  { %4284 = vmatpush1.bf16.msra.mxu1 %v4623_v62 }
 0x8fb   :  { %4286 = vmatprep.subr.bf16.mxu1 %v4624_v48 }
 0x8fe   :  { %4288 = vmatpush1.bf16.msra.mxu1 %v4626_v49 }
 0x8ff   :  { %4290 = vmatprep.subr.bf16.mxu1 %v4627_v50 }
 0x902   :  { %4292 = vmatpush1.bf16.msra.mxu1 %v4629_v39 }
 0x903   :  { %4294 = vmatprep.subr.bf16.mxu1 %v4630_v40 }
 0x9c4   :  { %v3044_v41 = vpop.f32.mrb[6].mxu1 }
 0x9c5   :  { %v4090_v42 = vpop.f32.mrb[7].mxu1 }
 0x9c8   :  { %v3117_v43 = vpop.f32.mrb[8].mxu1 }
 0x9c9   :  { %v3118_v44 = vadd.f32 %v3117_v43, %v3044_v41  ;;  %v4097_v45 = vpop.f32.mrb[9].mxu1 }
 0x9cb   :  { %v3127_v47 = vadd.f32 %v3125_v46, %v3118_v44 }
 0x9cd   :  { %vm3128_vm12 = vcmp.ge.f32.partialorder %v3127_v47, 0.0  ;;  %v3129_v51 = vmul.f32 0.2, %v3127_v47 }
 0x9cf   :  { %v3130_v52 = vsel %vm3128_vm12, %v3127_v47, %v3129_v51 }
 0x9d0   :  { %v3181_v54 = vrot.slane %v3130_v52, 2  ;;  %v3353_v9 = vrot.slane %v3130_v52, 4  ;;  %v3454_v15 = vrot.slane %v3130_v52, 6 }
 0x9d2   :  { %3709 = vmatmul.mubr.msk.f32.vlgmr.msra.gmra.mrb[10].mxu1 %vm406_vm1, %v3181_v54 }
 0x9d3   :  { %4296 = vmatpush1.bf16.msra.mxu1 %v4632_v53  ;;  %3321 = vmatprep.mubr.f32.mxu1 %v4771_v0 }
 0x9d4   :  { %4298 = vmatprep.subr.bf16.mxu1 %v4633_v55 }
 0x9d7   :  { %4300 = vmatpush1.bf16.msra.mxu1 %v4635_v56 }
 0x9d8   :  { %4302 = vmatprep.subr.bf16.mxu1 %v4636_v57 }
 0x9db   :  { %4304 = vmatpush1.bf16.msra.mxu1 %v4638_v58 }
 0x9dc   :  { %4306 = vmatprep.subr.bf16.mxu1 %v4639_v60 }
 0x9df   :  { %4308 = vmatpush1.bf16.msra.mxu1 %v4641_v61 }
 0x9e0   :  { %4310 = vmatprep.subr.bf16.mxu1 %v4642_v63 }
 0x9e2   :  { %3710 = vmatmul.mubr.msk.f32.vlgmr.msra.gmra.mrb[10].mxu1 %vm406_vm1, %v3130_v52 }
 0x9e3   :  { %4312 = vmatpush1.bf16.msra.mxu1 %v4644_v1  ;;  %3420 = vmatprep.mubr.f32.mxu1 %v4771_v0 }
 0x9e4   :  { %4314 = vmatprep.subr.bf16.mxu1 %v4645_v2 }
 0x9e7   :  { %4316 = vmatpush1.bf16.msra.mxu1 %v4647_v3 }
 0x9e8   :  { %4318 = vmatprep.subr.bf16.mxu1 %v4648_v4 }
 0x9eb   :  { %4320 = vmatpush1.bf16.msra.mxu1 %v4650_v5 }
 0x9ec   :  { %4322 = vmatprep.subr.bf16.mxu1 %v4651_v6 }
 0x9ef   :  { %4324 = vmatpush1.bf16.msra.mxu1 %v4653_v59 }
 0x9f0   :  { %4326 = vmatprep.subr.bf16.mxu1 %v4654_v7 }
 0x9f2   :  { %3719 = vmatmul.mubr.msk.f32.vlgmr.msra.gmra.mrb[10].mxu1 %vm406_vm1, %v3353_v9 }
 0x9f3   :  { %4328 = vmatpush1.bf16.msra.mxu1 %v4656_v8  ;;  %3521 = vmatprep.mubr.f32.mxu1 %v4771_v0  ;;  %v4665_v0 = vld [vmem:[%s5542_s14 + $0xf0] ss:$8 sps:$4 sm:$0xff]   ;;  %s4782_s14 = smov [#allocation8]  }
 0x9f4   :  { %4330 = vmatprep.subr.bf16.mxu1 %v4657_v10  ;;  %s3560_s20 = sshll.u32 %s4782_s14, 4  ;;  %s3561_s20 = int_to_ptr.vmem [resolvable:$true] %s3560_s20 }
 0x9f5   :  { %s4740_s8 = scalar_lea.vmem %s3561_s20, 64  ;;  %p4745_p11 = scmp.lt.s32.totalorder %s3561_s20, %s3561_s20 }
 0x9f6   :  { %p4741_p10 = scmp.ne.s32.totalorder %s3561_s20, %s4740_s8  ;;  %p4746_p12 = scmp.lt.s32.totalorder %s4740_s8, %s4740_s8 }
 0x9f7   :  { %4332 = vmatpush1.bf16.msra.mxu1 %v4659_v11 }
 0x9f8   :  { %4334 = vmatprep.subr.bf16.mxu1 %v4660_v12  ;;  %p4747_p13 = por %p4746_p12, %p4745_p11 }
 0x9fa   :  { %p4748_p0 = pnand %p4747_p13, %p4741_p10 }
 0x9fb   :  { %4336 = vmatpush1.bf16.msra.mxu1 %v4662_v13 }
 0x9fc   :  { %4338 = vmatprep.subr.bf16.mxu1 %v4663_v14 }
 0x9ff   :  { %4340 = vmatpush1.bf16.msra.mxu1 %v4665_v0 }
 0xa02   :  { %3728 = vmatmul.mubr.msk.f32.vlgmr.msra.gmra.mrb[10].mxu1 %vm406_vm1, %v3454_v15 }
 0xad5   :  { %v3523_v16 = vpop.f32.mrb[10].mxu1 }
 0xad6   :  { %v3530_v17 = vsub.f32 0.0, %v3523_v16  ;;  %v3525_v18 = vpop.f32.mrb[11].mxu1 }
 0xad7   :  { %v3531_v19 = vsub.f32 0.0, %v3525_v18 }
 0xad8   :  { %v3532_v20 = vmul.f32 1.442695, %v3530_v17 }
 0xad9   :  { %v3534_v21 = vmul.f32 1.442695, %v3531_v19 }
 0xada   :  { %4666 = vpow2.f32 %v3532_v20 }
 0xadb   :  { %4668 = vpow2.f32 %v3534_v21 }
 0xae4   :  { %v4667_v22 = vpop.eup %4666 }
 0xae5   :  { %v4669_v23 = vpop.eup %4668  ;;  %v3536_v24 = vadd.f32 1.0, %v4667_v22 }
 0xae6   :  { %v3537_v25 = vadd.f32 1.0, %v4669_v23 }
 0xae7   :  { %4670 = vrcp.f32 %v3536_v24 }
 0xae8   :  { %4672 = vrcp.f32 %v3537_v25 }
 0xaf1   :  { %v4671_v26 = vpop.eup %4670 }
 0xaf2   :  { %v4673_v27 = vpop.eup %4672 }
 0xaf3   :  { %v3544_v28 = vcombine.low %v4671_v26, %v4673_v27 }
 0xaf5   :  { %3729 = vst.sshfl [vmem:[#allocation8] sm:$0x33 pattern:$0x76325410] %v3544_v28 }
 0xaf6   :  { %4751 = shalt.err (!%p4748_p0)
}
 0xaf7   :  { %s4752_s22 = scalar_lea.hbm %s5543_s15, 64 }
 0xaf8   :  { %p4753_p1 = scmp.ne.s32.totalorder %s5543_s15, %s4752_s22  ;;  %p4756_p2 = scmp.lt.u32.totalorder %s4752_s22, %s5543_s15 }
 0xafa   :  { %p4758_p3 = pnand %p4756_p2, %p4753_p1 }
 0xafc   :  { %4761 = shalt.err (!%p4758_p3)
}
 0xafd   :  { %3563 = dma.vmem_to_hbm [thread:$0]  %s3561_s20, 64, %s5543_s15, [#allocation4]  }
 0xafe   :  { %4766 = dma.done.wait [#allocation4], 64  }
 0xaff   :  { %4767 = vsyncadd [#allocation4], 4294967232 }
 0xb00   :  { %3567 = vsyncpa [#allocation3], 1 }
 0xb01   :  { %3568 = vsyncpa [#allocation6], 1 }
 0xb02   :  { %3569 = vsyncpa [#allocation4], 1 }

</bundles_post_ra>
